<compile_context>
chip_gen: v7x
topology: tpu7x:2x2x1
jax: 0.10.0
libtpu: 0.0.40
codegen_flags: <defaults>
</compile_context>

<pallas_src>
import jax
import jax.numpy as jnp
import numpy as np
from jax.experimental import pallas as pl
from jax.experimental.pallas import tpu as pltpu

# ----------------------------- model sizes ---------------------------------
D_IN = 2          # input point dimension (spatial coords of the SPDE domain)
N_CENTERS = 100   # RBF centers
HIDDEN = 100      # width of every Linear layer
N_TANH = 3        # fc_hidden_layer + 2 hidden_layers (all tanh)
N_RELU = 4        # fc1..fc4
GAMMA = 1.0       # RBF bandwidth

# padded (lane / sublane aligned) sizes
KP = 128          # padded number of RBF centers
HP = 128          # padded hidden width
TM_MAX = 1024     # max rows (lanes) per grid step


# ------------------------------ kernel --------------------------------------
def _mlp_kernel(xt_ref, ct_ref, wt_ref, bt_ref, wr_ref, br_ref,
                wo_ref, bo_ref, o_ref):
    # Feature-major layout: every activation is (features, TM) with the TM
    # sample points living on the lane axis.
    x0 = xt_ref[0:1, :]                      # (1, TM)  x-coordinate row
    x1 = xt_ref[1:2, :]                      # (1, TM)  y-coordinate row
    c0 = ct_ref[:, 0:1]                      # (KP, 1)  center x-coordinates
    c1 = ct_ref[:, 1:2]                      # (KP, 1)  center y-coordinates

    # Gaussian RBF layer on the VPU: d2[k, i] = ||x_i - c_k||^2
    d0 = c0 - x0                             # (KP, TM) broadcast
    d1 = c1 - x1                             # (KP, TM)
    d2 = d0 * d0 + d1 * d1                   # always >= 0 (no cancellation)
    h = jnp.exp(-GAMMA * d2)                 # (KP, TM) transposed RBF features
    # padded-center rows (k >= 100) are harmless: the matching (transposed)
    # weight columns of the first tanh layer are zero.

    # tanh stack: fc_hidden_layer + hidden_layers     h <- tanh(W^T h + b)
    for l in range(N_TANH):
        h = jnp.tanh(jnp.dot(wt_ref[l], h,
                             preferred_element_type=jnp.float32) + bt_ref[l])

    # relu stack: fc1..fc4
    for l in range(N_RELU):
        h = jnp.maximum(jnp.dot(wr_ref[l], h,
                                preferred_element_type=jnp.float32)
                        + br_ref[l], 0.0)

    # fc5 head, already lane-dense: (1, HP) @ (HP, TM) -> (1, TM)
    o_ref[...] = jnp.dot(wo_ref[...], h,
                         preferred_element_type=jnp.float32) + bo_ref[...]


# ------------------------------ wrapper --------------------------------------
def _choose_tile(n):
    """Row tile: big enough to amortize per-step overhead, >=2 steps when
    possible so the parallel grid axis can use both v7x TensorCores."""
    n128 = ((n + 127) // 128) * 128
    tm = max(128, min(TM_MAX, n128 // 2))
    return (tm // 128) * 128


@jax.jit
def modified_model_forward(x, params):
    """x: (N, D_IN) float32  ->  (N, 1) float32"""
    n = x.shape[0]
    tm = _choose_tile(n)
    n_pad = ((n + tm - 1) // tm) * tm
    n_grid = n_pad // tm

    # narrow, transposed input: only D_IN=2 real rows, samples on the lane axis
    xt = jnp.zeros((D_IN, n_pad), jnp.float32).at[:, :n].set(x.T)

    out = pl.pallas_call(
        _mlp_kernel,
        out_shape=jax.ShapeDtypeStruct((1, n_pad), jnp.float32),
        grid_spec=pltpu.PrefetchScalarGridSpec(
            num_scalar_prefetch=0,
            grid=(n_grid,),
            in_specs=[
                pl.BlockSpec((D_IN, tm), lambda i: (0, i)),            # x^T
                pl.BlockSpec((KP, D_IN), lambda i: (0, 0)),            # centers
                pl.BlockSpec((N_TANH, HP, HP), lambda i: (0, 0, 0)),   # W^T tanh
                pl.BlockSpec((N_TANH, HP, 1), lambda i: (0, 0, 0)),    # b   tanh
                pl.BlockSpec((N_RELU, HP, HP), lambda i: (0, 0, 0)),   # W^T relu
                pl.BlockSpec((N_RELU, HP, 1), lambda i: (0, 0, 0)),    # b   relu
                pl.BlockSpec((1, HP), lambda i: (0, 0)),               # fc5 w^T
                pl.BlockSpec((1, 1), lambda i: (0, 0)),                # fc5 b
            ],
            out_specs=pl.BlockSpec((1, tm), lambda i: (0, i)),
        ),
        compiler_params=pltpu.CompilerParams(
            dimension_semantics=("parallel",)),
    )(xt, params["centers_t"], params["wt_t"], params["bt_t"],
      params["wr_t"], params["br_t"], params["wo_t"], params["bo_t"])

    return out[0, :n].reshape(n, 1)


# ----------------------- deterministic parameter init ------------------------
def init_params(seed=42):
    key = jax.random.PRNGKey(seed)
    ks = jax.random.split(key, 32)
    ki = iter(ks)

    def linear(kin, kout, kkey):
        bound = 1.0 / np.sqrt(kin)
        w = jax.random.uniform(kkey, (kin, kout), jnp.float32, -bound, bound)
        b = jax.random.uniform(jax.random.fold_in(kkey, 1),
                               (kout,), jnp.float32, -bound, bound)
        return w, b

    centers = jax.random.uniform(next(ki), (N_CENTERS, D_IN),
                                 jnp.float32, -1.0, 1.0)

    w_tanh, b_tanh = [], []
    for l in range(N_TANH):
        w, b = linear(N_CENTERS if l == 0 else HIDDEN, HIDDEN, next(ki))
        w_tanh.append(w)
        b_tanh.append(b)

    w_relu, b_relu = [], []
    for _ in range(N_RELU):
        w, b = linear(HIDDEN, HIDDEN, next(ki))
        w_relu.append(w)
        b_relu.append(b)

    w_out, b_out = linear(HIDDEN, 1, next(ki))

    # ---- pre-transposed, zero-padded, lane-aligned tensors for the kernel ----
    centers_t = jnp.zeros((KP, D_IN), jnp.float32).at[:N_CENTERS, :].set(centers)

    wt_t = jnp.zeros((N_TANH, HP, HP), jnp.float32)
    bt_t = jnp.zeros((N_TANH, HP, 1), jnp.float32)
    for l in range(N_TANH):
        kin = w_tanh[l].shape[0]
        wt_t = wt_t.at[l, :HIDDEN, :kin].set(w_tanh[l].T)
        bt_t = bt_t.at[l, :HIDDEN, 0].set(b_tanh[l])

    wr_t = jnp.zeros((N_RELU, HP, HP), jnp.float32)
    br_t = jnp.zeros((N_RELU, HP, 1), jnp.float32)
    for l in range(N_RELU):
        wr_t = wr_t.at[l, :HIDDEN, :HIDDEN].set(w_relu[l].T)
        br_t = br_t.at[l, :HIDDEN, 0].set(b_relu[l])

    wo_t = jnp.zeros((1, HP), jnp.float32).at[0, :HIDDEN].set(w_out[:, 0])
    bo_t = jnp.reshape(b_out, (1, 1)).astype(jnp.float32)

    unpadded = dict(centers=centers, w_tanh=w_tanh, b_tanh=b_tanh,
                    w_relu=w_relu, b_relu=b_relu, w_out=w_out, b_out=b_out)
    padded = dict(centers_t=centers_t, wt_t=wt_t, bt_t=bt_t,
                  wr_t=wr_t, br_t=br_t, wo_t=wo_t, bo_t=bo_t)
    return padded, unpadded


# ----------------------------- pure-JAX reference ----------------------------
def reference_forward(x, u):
    d2 = jnp.sum((x[:, None, :] - u["centers"][None, :, :]) ** 2, axis=-1)
    h = jnp.exp(-GAMMA * d2)
    for l in range(N_TANH):
        h = jnp.tanh(h @ u["w_tanh"][l] + u["b_tanh"][l])
    for l in range(N_RELU):
        h = jax.nn.relu(h @ u["w_relu"][l] + u["b_relu"][l])
    return h @ u["w_out"] + u["b_out"]


# --------------------------------- main --------------------------------------
if __name__ == "__main__":
    N = 256  # number of sample points
    x = jax.random.uniform(jax.random.PRNGKey(0), (N, D_IN),
                           jnp.float32, -1.0, 1.0)

    padded_params, unpadded_params = init_params(seed=42)

    y = modified_model_forward(x, padded_params)
    y = jax.block_until_ready(y)

    y_ref = reference_forward(x, unpadded_params)
    np.testing.assert_allclose(np.asarray(y), np.asarray(y_ref),
                               rtol=1e-4, atol=1e-4)
    assert y.shape == (N, 1)
    print("KERNEL_OK")
</pallas_src>

<mosaic_0001>
module attributes {stable_mosaic.version = 11 : i64} {
  func.func @_mlp_kernel(%arg0: i32, %arg1: memref<2x128xf32, #tpu.memory_space<vmem>>, %arg2: memref<128x2xf32, #tpu.memory_space<vmem>>, %arg3: memref<3x128x128xf32, #tpu.memory_space<vmem>>, %arg4: memref<3x128x1xf32, #tpu.memory_space<vmem>>, %arg5: memref<4x128x128xf32, #tpu.memory_space<vmem>>, %arg6: memref<4x128x1xf32, #tpu.memory_space<vmem>>, %arg7: memref<1x128xf32, #tpu.memory_space<vmem>>, %arg8: memref<1x1xf32, #tpu.memory_space<vmem>>, %arg9: memref<1x128xf32, #tpu.memory_space<vmem>>) attributes {dimension_semantics = [#tpu.dimension_semantics<parallel>], iteration_bounds = array<i64: 2>, scalar_prefetch = 0 : i64, scratch_operands = 0 : i64, tpu.core_type = #tpu.core_type<tc>, window_params = [{transform_indices = @transform_0, window_bounds = array<i64: 2, 128>}, {pipeline_mode = #tpu.pipeline_mode<synchronous>, transform_indices = @transform_1, window_bounds = array<i64: 128, 2>}, {pipeline_mode = #tpu.pipeline_mode<synchronous>, transform_indices = @transform_2, window_bounds = array<i64: 3, 128, 128>}, {pipeline_mode = #tpu.pipeline_mode<synchronous>, transform_indices = @transform_3, window_bounds = array<i64: 3, 128, 1>}, {pipeline_mode = #tpu.pipeline_mode<synchronous>, transform_indices = @transform_4, window_bounds = array<i64: 4, 128, 128>}, {pipeline_mode = #tpu.pipeline_mode<synchronous>, transform_indices = @transform_5, window_bounds = array<i64: 4, 128, 1>}, {pipeline_mode = #tpu.pipeline_mode<synchronous>, transform_indices = @transform_6, window_bounds = array<i64: 1, 128>}, {pipeline_mode = #tpu.pipeline_mode<synchronous>, transform_indices = @transform_7, window_bounds = array<i64: 1, 1>}, {transform_indices = @transform_8, window_bounds = array<i64: 1, 128>}]} {
    %c0 = arith.constant 0 : index
    %c0_0 = arith.constant 0 : index
    %0 = vector.load %arg1[%c0, %c0_0] : memref<2x128xf32, #tpu.memory_space<vmem>>, vector<1x128xf32>
    %c1 = arith.constant 1 : index
    %c0_1 = arith.constant 0 : index
    %1 = vector.load %arg1[%c1, %c0_1] : memref<2x128xf32, #tpu.memory_space<vmem>>, vector<1x128xf32>
    %c0_2 = arith.constant 0 : index
    %c0_3 = arith.constant 0 : index
    %2 = vector.load %arg2[%c0_2, %c0_3] : memref<128x2xf32, #tpu.memory_space<vmem>>, vector<128x1xf32>
    %c0_4 = arith.constant 0 : index
    %c1_5 = arith.constant 1 : index
    %3 = vector.load %arg2[%c0_4, %c1_5] : memref<128x2xf32, #tpu.memory_space<vmem>>, vector<128x1xf32>
    %4 = vector.broadcast %2 : vector<128x1xf32> to vector<128x128xf32>
    %5 = vector.broadcast %0 : vector<1x128xf32> to vector<128x128xf32>
    %6 = arith.subf %4, %5 : vector<128x128xf32>
    %7 = vector.broadcast %3 : vector<128x1xf32> to vector<128x128xf32>
    %8 = vector.broadcast %1 : vector<1x128xf32> to vector<128x128xf32>
    %9 = arith.subf %7, %8 : vector<128x128xf32>
    %10 = arith.mulf %6, %6 : vector<128x128xf32>
    %11 = arith.mulf %9, %9 : vector<128x128xf32>
    %12 = arith.addf %10, %11 : vector<128x128xf32>
    %cst = arith.constant -1.000000e+00 : f32
    %13 = vector.broadcast %cst : f32 to vector<128x128xf32>
    %14 = arith.mulf %13, %12 : vector<128x128xf32>
    %15 = math.exp %14 : vector<128x128xf32>
    %c0_6 = arith.constant 0 : index
    %c0_7 = arith.constant 0 : index
    %c0_8 = arith.constant 0 : index
    %16 = vector.load %arg3[%c0_6, %c0_7, %c0_8] : memref<3x128x128xf32, #tpu.memory_space<vmem>>, vector<1x128x128xf32>
    %17 = vector.shape_cast %16 : vector<1x128x128xf32> to vector<128x128xf32>
    %cst_9 = arith.constant dense<0.000000e+00> : vector<128x128xf32>
    %18 = tpu.matmul %17, %15, %cst_9 {dimension_numbers = #tpu.dot_dimension_numbers<[1], [0], [0], [1], [0, 0, 1, 1], [], []>} : vector<128x128xf32>, vector<128x128xf32>, vector<128x128xf32> -> vector<128x128xf32>
    %c0_10 = arith.constant 0 : index
    %c0_11 = arith.constant 0 : index
    %c0_12 = arith.constant 0 : index
    %19 = vector.load %arg4[%c0_10, %c0_11, %c0_12] : memref<3x128x1xf32, #tpu.memory_space<vmem>>, vector<1x128x1xf32>
    %20 = vector.shape_cast %19 : vector<1x128x1xf32> to vector<128x1xf32>
    %21 = vector.broadcast %20 : vector<128x1xf32> to vector<128x128xf32>
    %22 = arith.addf %18, %21 : vector<128x128xf32>
    %23 = math.tanh %22 : vector<128x128xf32>
    %c1_13 = arith.constant 1 : index
    %c0_14 = arith.constant 0 : index
    %c0_15 = arith.constant 0 : index
    %24 = vector.load %arg3[%c1_13, %c0_14, %c0_15] : memref<3x128x128xf32, #tpu.memory_space<vmem>>, vector<1x128x128xf32>
    %25 = vector.shape_cast %24 : vector<1x128x128xf32> to vector<128x128xf32>
    %cst_16 = arith.constant dense<0.000000e+00> : vector<128x128xf32>
    %26 = tpu.matmul %25, %23, %cst_16 {dimension_numbers = #tpu.dot_dimension_numbers<[1], [0], [0], [1], [0, 0, 1, 1], [], []>} : vector<128x128xf32>, vector<128x128xf32>, vector<128x128xf32> -> vector<128x128xf32>
    %c1_17 = arith.constant 1 : index
    %c0_18 = arith.constant 0 : index
    %c0_19 = arith.constant 0 : index
    %27 = vector.load %arg4[%c1_17, %c0_18, %c0_19] : memref<3x128x1xf32, #tpu.memory_space<vmem>>, vector<1x128x1xf32>
    %28 = vector.shape_cast %27 : vector<1x128x1xf32> to vector<128x1xf32>
    %29 = vector.broadcast %28 : vector<128x1xf32> to vector<128x128xf32>
    %30 = arith.addf %26, %29 : vector<128x128xf32>
    %31 = math.tanh %30 : vector<128x128xf32>
    %c2 = arith.constant 2 : index
    %c0_20 = arith.constant 0 : index
    %c0_21 = arith.constant 0 : index
    %32 = vector.load %arg3[%c2, %c0_20, %c0_21] : memref<3x128x128xf32, #tpu.memory_space<vmem>>, vector<1x128x128xf32>
    %33 = vector.shape_cast %32 : vector<1x128x128xf32> to vector<128x128xf32>
    %cst_22 = arith.constant dense<0.000000e+00> : vector<128x128xf32>
    %34 = tpu.matmul %33, %31, %cst_22 {dimension_numbers = #tpu.dot_dimension_numbers<[1], [0], [0], [1], [0, 0, 1, 1], [], []>} : vector<128x128xf32>, vector<128x128xf32>, vector<128x128xf32> -> vector<128x128xf32>
    %c2_23 = arith.constant 2 : index
    %c0_24 = arith.constant 0 : index
    %c0_25 = arith.constant 0 : index
    %35 = vector.load %arg4[%c2_23, %c0_24, %c0_25] : memref<3x128x1xf32, #tpu.memory_space<vmem>>, vector<1x128x1xf32>
    %36 = vector.shape_cast %35 : vector<1x128x1xf32> to vector<128x1xf32>
    %37 = vector.broadcast %36 : vector<128x1xf32> to vector<128x128xf32>
    %38 = arith.addf %34, %37 : vector<128x128xf32>
    %39 = math.tanh %38 : vector<128x128xf32>
    %c0_26 = arith.constant 0 : index
    %c0_27 = arith.constant 0 : index
    %c0_28 = arith.constant 0 : index
    %40 = vector.load %arg5[%c0_26, %c0_27, %c0_28] : memref<4x128x128xf32, #tpu.memory_space<vmem>>, vector<1x128x128xf32>
    %41 = vector.shape_cast %40 : vector<1x128x128xf32> to vector<128x128xf32>
    %cst_29 = arith.constant dense<0.000000e+00> : vector<128x128xf32>
    %42 = tpu.matmul %41, %39, %cst_29 {dimension_numbers = #tpu.dot_dimension_numbers<[1], [0], [0], [1], [0, 0, 1, 1], [], []>} : vector<128x128xf32>, vector<128x128xf32>, vector<128x128xf32> -> vector<128x128xf32>
    %c0_30 = arith.constant 0 : index
    %c0_31 = arith.constant 0 : index
    %c0_32 = arith.constant 0 : index
    %43 = vector.load %arg6[%c0_30, %c0_31, %c0_32] : memref<4x128x1xf32, #tpu.memory_space<vmem>>, vector<1x128x1xf32>
    %44 = vector.shape_cast %43 : vector<1x128x1xf32> to vector<128x1xf32>
    %45 = vector.broadcast %44 : vector<128x1xf32> to vector<128x128xf32>
    %46 = arith.addf %42, %45 : vector<128x128xf32>
    %cst_33 = arith.constant 0.000000e+00 : f32
    %47 = vector.broadcast %cst_33 : f32 to vector<128x128xf32>
    %48 = arith.maximumf %46, %47 : vector<128x128xf32>
    %c1_34 = arith.constant 1 : index
    %c0_35 = arith.constant 0 : index
    %c0_36 = arith.constant 0 : index
    %49 = vector.load %arg5[%c1_34, %c0_35, %c0_36] : memref<4x128x128xf32, #tpu.memory_space<vmem>>, vector<1x128x128xf32>
    %50 = vector.shape_cast %49 : vector<1x128x128xf32> to vector<128x128xf32>
    %cst_37 = arith.constant dense<0.000000e+00> : vector<128x128xf32>
    %51 = tpu.matmul %50, %48, %cst_37 {dimension_numbers = #tpu.dot_dimension_numbers<[1], [0], [0], [1], [0, 0, 1, 1], [], []>} : vector<128x128xf32>, vector<128x128xf32>, vector<128x128xf32> -> vector<128x128xf32>
    %c1_38 = arith.constant 1 : index
    %c0_39 = arith.constant 0 : index
    %c0_40 = arith.constant 0 : index
    %52 = vector.load %arg6[%c1_38, %c0_39, %c0_40] : memref<4x128x1xf32, #tpu.memory_space<vmem>>, vector<1x128x1xf32>
    %53 = vector.shape_cast %52 : vector<1x128x1xf32> to vector<128x1xf32>
    %54 = vector.broadcast %53 : vector<128x1xf32> to vector<128x128xf32>
    %55 = arith.addf %51, %54 : vector<128x128xf32>
    %cst_41 = arith.constant 0.000000e+00 : f32
    %56 = vector.broadcast %cst_41 : f32 to vector<128x128xf32>
    %57 = arith.maximumf %55, %56 : vector<128x128xf32>
    %c2_42 = arith.constant 2 : index
    %c0_43 = arith.constant 0 : index
    %c0_44 = arith.constant 0 : index
    %58 = vector.load %arg5[%c2_42, %c0_43, %c0_44] : memref<4x128x128xf32, #tpu.memory_space<vmem>>, vector<1x128x128xf32>
    %59 = vector.shape_cast %58 : vector<1x128x128xf32> to vector<128x128xf32>
    %cst_45 = arith.constant dense<0.000000e+00> : vector<128x128xf32>
    %60 = tpu.matmul %59, %57, %cst_45 {dimension_numbers = #tpu.dot_dimension_numbers<[1], [0], [0], [1], [0, 0, 1, 1], [], []>} : vector<128x128xf32>, vector<128x128xf32>, vector<128x128xf32> -> vector<128x128xf32>
    %c2_46 = arith.constant 2 : index
    %c0_47 = arith.constant 0 : index
    %c0_48 = arith.constant 0 : index
    %61 = vector.load %arg6[%c2_46, %c0_47, %c0_48] : memref<4x128x1xf32, #tpu.memory_space<vmem>>, vector<1x128x1xf32>
    %62 = vector.shape_cast %61 : vector<1x128x1xf32> to vector<128x1xf32>
    %63 = vector.broadcast %62 : vector<128x1xf32> to vector<128x128xf32>
    %64 = arith.addf %60, %63 : vector<128x128xf32>
    %cst_49 = arith.constant 0.000000e+00 : f32
    %65 = vector.broadcast %cst_49 : f32 to vector<128x128xf32>
    %66 = arith.maximumf %64, %65 : vector<128x128xf32>
    %c3 = arith.constant 3 : index
    %c0_50 = arith.constant 0 : index
    %c0_51 = arith.constant 0 : index
    %67 = vector.load %arg5[%c3, %c0_50, %c0_51] : memref<4x128x128xf32, #tpu.memory_space<vmem>>, vector<1x128x128xf32>
    %68 = vector.shape_cast %67 : vector<1x128x128xf32> to vector<128x128xf32>
    %cst_52 = arith.constant dense<0.000000e+00> : vector<128x128xf32>
    %69 = tpu.matmul %68, %66, %cst_52 {dimension_numbers = #tpu.dot_dimension_numbers<[1], [0], [0], [1], [0, 0, 1, 1], [], []>} : vector<128x128xf32>, vector<128x128xf32>, vector<128x128xf32> -> vector<128x128xf32>
    %c3_53 = arith.constant 3 : index
    %c0_54 = arith.constant 0 : index
    %c0_55 = arith.constant 0 : index
    %70 = vector.load %arg6[%c3_53, %c0_54, %c0_55] : memref<4x128x1xf32, #tpu.memory_space<vmem>>, vector<1x128x1xf32>
    %71 = vector.shape_cast %70 : vector<1x128x1xf32> to vector<128x1xf32>
    %72 = vector.broadcast %71 : vector<128x1xf32> to vector<128x128xf32>
    %73 = arith.addf %69, %72 : vector<128x128xf32>
    %cst_56 = arith.constant 0.000000e+00 : f32
    %74 = vector.broadcast %cst_56 : f32 to vector<128x128xf32>
    %75 = arith.maximumf %73, %74 : vector<128x128xf32>
    %c0_57 = arith.constant 0 : index
    %c0_58 = arith.constant 0 : index
    %76 = vector.load %arg7[%c0_57, %c0_58] : memref<1x128xf32, #tpu.memory_space<vmem>>, vector<1x128xf32>
    %cst_59 = arith.constant dense<0.000000e+00> : vector<1x128xf32>
    %77 = tpu.matmul %76, %75, %cst_59 {dimension_numbers = #tpu.dot_dimension_numbers<[1], [0], [0], [1], [0, 0, 1, 1], [], []>} : vector<1x128xf32>, vector<128x128xf32>, vector<1x128xf32> -> vector<1x128xf32>
    %c0_60 = arith.constant 0 : index
    %c0_61 = arith.constant 0 : index
    %78 = vector.load %arg8[%c0_60, %c0_61] : memref<1x1xf32, #tpu.memory_space<vmem>>, vector<1x1xf32>
    %79 = vector.broadcast %78 : vector<1x1xf32> to vector<1x128xf32>
    %80 = arith.addf %77, %79 : vector<1x128xf32>
    %c0_62 = arith.constant 0 : index
    %c0_63 = arith.constant 0 : index
    %81 = vector.load %arg9[%c0_62, %c0_63] : memref<1x128xf32, #tpu.memory_space<vmem>>, vector<1x128xf32>
    tpu.vector_store %arg9[%c0_62, %c0_63], %80 {strides = array<i32>} : memref<1x128xf32, #tpu.memory_space<vmem>>, vector<1x128xf32>,
    return
  }
  func.func @transform_0(%arg0: i32) -> (i32, i32) {
    %c0_i32 = arith.constant 0 : i32
    %c0_i32_0 = arith.constant 0 : i32
    return %c0_i32, %arg0 : i32, i32
  }
  func.func @transform_1(%arg0: i32) -> (i32, i32) {
    %c0_i32 = arith.constant 0 : i32
    %c0_i32_0 = arith.constant 0 : i32
    %c0_i32_1 = arith.constant 0 : i32
    return %c0_i32, %c0_i32_0 : i32, i32
  }
  func.func @transform_2(%arg0: i32) -> (i32, i32, i32) {
    %c0_i32 = arith.constant 0 : i32
    %c0_i32_0 = arith.constant 0 : i32
    %c0_i32_1 = arith.constant 0 : i32
    %c0_i32_2 = arith.constant 0 : i32
    return %c0_i32, %c0_i32_0, %c0_i32_1 : i32, i32, i32
  }
  func.func @transform_3(%arg0: i32) -> (i32, i32, i32) {
    %c0_i32 = arith.constant 0 : i32
    %c0_i32_0 = arith.constant 0 : i32
    %c0_i32_1 = arith.constant 0 : i32
    %c0_i32_2 = arith.constant 0 : i32
    return %c0_i32, %c0_i32_0, %c0_i32_1 : i32, i32, i32
  }
  func.func @transform_4(%arg0: i32) -> (i32, i32, i32) {
    %c0_i32 = arith.constant 0 : i32
    %c0_i32_0 = arith.constant 0 : i32
    %c0_i32_1 = arith.constant 0 : i32
    %c0_i32_2 = arith.constant 0 : i32
    return %c0_i32, %c0_i32_0, %c0_i32_1 : i32, i32, i32
  }
  func.func @transform_5(%arg0: i32) -> (i32, i32, i32) {
    %c0_i32 = arith.constant 0 : i32
    %c0_i32_0 = arith.constant 0 : i32
    %c0_i32_1 = arith.constant 0 : i32
    %c0_i32_2 = arith.constant 0 : i32
    return %c0_i32, %c0_i32_0, %c0_i32_1 : i32, i32, i32
  }
  func.func @transform_6(%arg0: i32) -> (i32, i32) {
    %c0_i32 = arith.constant 0 : i32
    %c0_i32_0 = arith.constant 0 : i32
    %c0_i32_1 = arith.constant 0 : i32
    return %c0_i32, %c0_i32_0 : i32, i32
  }
  func.func @transform_7(%arg0: i32) -> (i32, i32) {
    %c0_i32 = arith.constant 0 : i32
    %c0_i32_0 = arith.constant 0 : i32
    %c0_i32_1 = arith.constant 0 : i32
    return %c0_i32, %c0_i32_0 : i32, i32
  }
  func.func @transform_8(%arg0: i32) -> (i32, i32) {
    %c0_i32 = arith.constant 0 : i32
    %c0_i32_0 = arith.constant 0 : i32
    return %c0_i32, %arg0 : i32, i32
  }
}

</mosaic_0001>

<bundles_post_ra>
// kernel: modified_model_forward.1
= control target key start
LH: loop header
LB: loop body
LE: loop exit
PB: predicated region body
PF: predicated region fallthrough
CT: control target
= control target key end

     0   :  { %s4981_s0 = inlined_call_operand.vmem [shape: f32[2,256], index: 0, kind: input, shape index: {}]   ;;  %s4982_s1 = inlined_call_operand.vmem [shape: f32[128,2], index: 1, kind: input, shape index: {}]   ;;  %s4983_s2 = inlined_call_operand.vmem [shape: f32[3,128,128], index: 2, kind: input, shape index: {}]   ;;  %s4984_s3 = inlined_call_operand.vmem [shape: f32[3,128,1], index: 3, kind: input, shape index: {}]   ;;  %s4985_s4 = inlined_call_operand.vmem [shape: f32[4,128,128], index: 4, kind: input, shape index: {}]   ;;  %s4986_s5 = inlined_call_operand.vmem [shape: f32[4,128,1], index: 5, kind: input, shape index: {}]   ;;  %s4987_s6 = inlined_call_operand.vmem [shape: f32[1,128], index: 6, kind: input, shape index: {}]   ;;  %s4988_s7 = inlined_call_operand.<no memory space> [shape: f32[1,1], index: 7, kind: input, shape index: {}]   ;;  %s4989_s8 = inlined_call_operand.hbm [shape: f32[1,256], index: 8, kind: output, shape index: {}]  }
   0x1   :  { %v13_v0 = vstv %s4988_s7 }
   0x2   :  { %14 = vst [vmem:[#allocation2] sm:$0x1] %v13_v0 }
   0x3   :  { %15 = vsyncpa [#allocation4], 0 }
   0x4   :  { %17 = vsyncpa [#allocation4 + $0x1], 0  ;;  %s4067_s29 = smov 0   ;;  %s4069_s30 = smov 0  }
   0x5   :  { %s4071_s9 = smov 0   ;;  %s4073_s10 = smov 0  }
   0x6 LB: > { %s4088_s7 = sadd.s32 4294967295, %s4011_s10   ;;  %s2671_s11 = sadd.s32 4294967294, %s4011_s10   ;;  %s4011_s10 = sphi %s4073_s10, %s4995_s10   ;;  %s4007_s9 = sphi %s4071_s9, %s4994_s9   ;;  %s4003_s30 = sphi %s4069_s30, %s4993_s30   ;;  %s3999_s29 = sphi %s4067_s29, %s4992_s29  }
   0x7   : > { %s4092_s12 = sadd.s32 1, %s4011_s10   ;;  %s203_s13 = sadd.s32 1, %s4007_s9 }
   0x8   : > { %s200_s14 = ssub.s32 %s4011_s10, %s4092_s12  ;;  %p213_p0 = scmp.ne.s32.totalorder %s4007_s9, %s4003_s30 }
   0x9   : > { %p201_p1 = scmp.eq.s32.totalorder %s200_s14, 0  ;;  %p214_p2 = scmp.eq.s32.totalorder %s4088_s7, 1 }
   0xa   : > { %p219_p3 = scmp.ne.s32.totalorder %s4003_s30, %s3999_s29  ;;  %p220_p4 = scmp.eq.s32.totalorder %s2671_s11, 1 }
   0xb   : > { %s4103_s15 = scalar_select %p201_p1, %s4007_s9, %s203_s13  }
   0xc   : > { %p4105_p5 = por %p214_p2, %p213_p0  ;;  %p4109_p6 = por %p220_p4, %p219_p3 }
   0xd   : > { %p2674_p7 = scmp.ge.s32.totalorder %s4011_s10, 1  ;;  %p266_p8 = scmp.lt.s32.totalorder %s4011_s10, 3 }
   0xf   : > { %p267_p9 = pnand %p2674_p7, %p266_p8 }
  0x10   : > { %v306_v1 = vld [vmem:[%s4982_s1 + $0x10] sm:$0xff] (!%p267_p9)  ;;  %v304_v2 = vld [vmem:[%s4982_s1] sm:$0xff] (!%p267_p9)  ;;  %v4013_v3 = vmov (!%p267_p9), 1   ;;  %v305_v5 = vld [vmem:[%s4982_s1 + $0x8] sm:$0xff] (!%p267_p9)  ;;  %v4014_v8 = vmov (!%p267_p9), 0   ;;  %p298_p10 = scmp.lt.s32.totalorder (!%p267_p9), %s4088_s7, 1 }
  0x11   : > { %270 = sbr.rel (%p267_p9) target bundleno = 2270 (0x8de), region = 52  ;;  %3803 = vset.pattern.permute.xlu0 (!%p267_p9), %v4013_v3  ;;  %3801 = vset.pattern.permute.xlu1 (!%p267_p9), %v4013_v3  ;;  %v310_v4 = vld [vmem:[%s4982_s1 + $0x30] sm:$0xff] (!%p267_p9)  ;;  %v307_v7 = vld [vmem:[%s4982_s1 + $0x18] sm:$0xff] (!%p267_p9)  ;;  %v308_v9 = vld [vmem:[%s4982_s1 + $0x20] sm:$0xff] (!%p267_p9)  ;;  %vm4016_vm0 = vmmov (!%p267_p9), 0   ;;  %s296_s11 = sand.u32 (!%p267_p9), 1, %s4003_s30  }
  0x12   : > { %429 = vperm.xlu0 (!%p267_p9), %3803, %v306_v1   ;;  %421 = vperm.xlu1 (!%p267_p9), %3801, %v304_v2   ;;  %v314_v6 = vld [vmem:[%s4982_s1 + $0x50] sm:$0xff] (!%p267_p9)  ;;  %v309_v10 = vld [vmem:[%s4982_s1 + $0x28] sm:$0xff] (!%p267_p9)  ;;  %v311_v12 = vld [vmem:[%s4982_s1 + $0x38] sm:$0xff] (!%p267_p9)  ;;  %s2838_s13 = sshll.u32 (!%p267_p9), %s4088_s7, 4  ;;  %s2604_s22 = scalar_lea.sflag (!%p267_p9), [#allocation4], %s296_s11 }
  0x13   : > { %v313_v11 = vld [vmem:[%s4982_s1 + $0x48] sm:$0xff] (!%p267_p9)  ;;  %v312_v14 = vld [vmem:[%s4982_s1 + $0x40] sm:$0xff] (!%p267_p9)  ;;  %v318_v15 = vld [vmem:[%s4982_s1 + $0x70] sm:$0xff] (!%p267_p9)  ;;  %s4939_s21 = scalar_lea.hbm (!%p267_p9), %s4989_s8, %s2838_s13 }
  0x14   : > { %v317_v13 = vld [vmem:[%s4982_s1 + $0x68] sm:$0xff] (!%p267_p9)  ;;  %v315_v17 = vld [vmem:[%s4982_s1 + $0x58] sm:$0xff] (!%p267_p9)  ;;  %v620_v18 = vld [vmem:[%s4984_s3 + $0x20] sm:$0xff] (!%p267_p9) }
  0x15   : > { %v617_v16 = vld [vmem:[%s4984_s3 + $0x8] sm:$0xff] (!%p267_p9)  ;;  %v622_v19 = vld [vmem:[%s4984_s3 + $0x30] sm:$0xff] (!%p267_p9)  ;;  %v316_v20 = vld [vmem:[%s4982_s1 + $0x60] sm:$0xff] (!%p267_p9) }
  0x16   : > { %445 = vperm.xlu0 (!%p267_p9), %3803, %v310_v4   ;;  %425 = vperm.xlu1 (!%p267_p9), %3801, %v305_v5   ;;  %v624_v21 = vld [vmem:[%s4984_s3 + $0x40] sm:$0xff] (!%p267_p9)  ;;  %v626_v22 = vld [vmem:[%s4984_s3 + $0x50] sm:$0xff] (!%p267_p9)  ;;  %v319_v25 = vld [vmem:[%s4982_s1 + $0x78] sm:$0xff] (!%p267_p9) }
  0x17   : > { %v628_v23 = vld [vmem:[%s4984_s3 + $0x60] sm:$0xff] (!%p267_p9)  ;;  %v630_v24 = vld [vmem:[%s4984_s3 + $0x70] sm:$0xff] (!%p267_p9)  ;;  %v619_v32 = vld [vmem:[%s4984_s3 + $0x18] sm:$0xff] (!%p267_p9) }
  0x18   : > { %v2694_v26 = vld [vmem:[%s4984_s3 + $0x80] sm:$0xff]  ;;  %v2696_v27 = vld [vmem:[%s4984_s3 + $0x90] sm:$0xff]  ;;  %v621_v34 = vld [vmem:[%s4984_s3 + $0x28] sm:$0xff]  ;;  %s299_s26 = scalar_select %p298_p10, %s4088_s7, 1 }
  0x19   : > { %v616_v28 = vld [vmem:[%s4984_s3] sm:$0xff]  ;;  %v618_v30 = vld [vmem:[%s4984_s3 + $0x10] sm:$0xff]  ;;  %v623_v36 = vld [vmem:[%s4984_s3 + $0x38] sm:$0xff]  ;;  %s4018_s7 = smov [#allocation3]  }
  0x1a   : > { %461 = vperm.xlu0 %3803, %v314_v6   ;;  %3802 = vset.pattern.permute.xlu1 %v4014_v8  ;;  %v2698_v29 = vld [vmem:[%s4984_s3 + $0xa0] sm:$0xff]  ;;  %v2700_v31 = vld [vmem:[%s4984_s3 + $0xb0] sm:$0xff]  ;;  %v625_v38 = vld [vmem:[%s4984_s3 + $0x48] sm:$0xff]  ;;  %s2675_s14 = sshll.u32 %s299_s26, 1 }
  0x1b   : > { %337 = vperm.xlu1 %3802, %v307_v7   ;;  %v2702_v33 = vld [vmem:[%s4984_s3 + $0xc0] sm:$0xff]  ;;  %v2704_v35 = vld [vmem:[%s4984_s3 + $0xd0] sm:$0xff]  ;;  %v627_v41 = vld [vmem:[%s4984_s3 + $0x58] sm:$0xff]  ;;  %s301_s24 = scalar_lea.vmem %s4981_s0, %s2675_s14  ;;  %s297_s14 = scalar_lea.vmem [#allocation3], %s296_s11 }
  0x1c   : > { %v2706_v37 = vld [vmem:[%s4984_s3 + $0xe0] sm:$0xff]  ;;  %v2708_v39 = vld [vmem:[%s4984_s3 + $0xf0] sm:$0xff]  ;;  %v629_v43 = vld [vmem:[%s4984_s3 + $0x68] sm:$0xff]  ;;  %s2616_s18 = sshll.u32 %s297_s14, 4  ;;  %s4941_s18 = int_to_ptr.vmem [resolvable:$true] %s2616_s18 }
  0x1d   : > { %v600_v40 = vld [vmem:[%s4983_s2] sm:$0xff]  ;;  %v2728_v44 = vld [vmem:[%s4984_s3 + $0x110] sm:$0xff]  ;;  %v631_v45 = vld [vmem:[%s4984_s3 + $0x78] sm:$0xff]  ;;  %s3949_s23 = scalar_lea.vmem %s4941_s18, 16 }
  0x1e   : > { %3812 = vset.pattern.permute.xlu0 %v4014_v8  ;;  %v2726_v42 = vld [vmem:[%s4984_s3 + $0x100] sm:$0xff]  ;;  %3114 = vmatprep.mubr.f32.mxu0 %v600_v40  ;;  %v2695_v47 = vld [vmem:[%s4984_s3 + $0x88] sm:$0xff]  ;;  %v2732_v48 = vld [vmem:[%s4984_s3 + $0x130] sm:$0xff]  ;;  %p3950_p11 = scmp.ne.s32.totalorder %s4941_s18, %s3949_s23 }
  0x1f   : > { %322 = vperm.xlu0 %3812, %v304_v2   ;;  %3804 = vset.pattern.permute.xlu1 %v4013_v3  ;;  %v2730_v46 = vld [vmem:[%s4984_s3 + $0x120] sm:$0xff]  ;;  %v2697_v51 = vld [vmem:[%s4984_s3 + $0x98] sm:$0xff]  ;;  %v2699_v55 = vld [vmem:[%s4984_s3 + $0xa8] sm:$0xff] }
  0x20   : > { %433 = vperm.xlu1 %3804, %v307_v7   ;;  %v2734_v52 = vld [vmem:[%s4984_s3 + $0x140] sm:$0xff]  ;;  %v2736_v56 = vld [vmem:[%s4984_s3 + $0x150] sm:$0xff]  ;;  %v2701_v60 = vld [vmem:[%s4984_s3 + $0xb8] sm:$0xff]  ;;  %p3951_p12 = pnand %p3950_p11, %p4105_p5 }
  0x21   : > { %v4294_v58 = vld [vmem:[%s301_s24 + $0x1] ss:$0 sm:$0xff]  ;;  %v4302_v62 = vld [vmem:[%s301_s24] ss:$0 sm:$0xff]  ;;  %v2703_v2 = vld [vmem:[%s4984_s3 + $0xc8] sm:$0xff]  ;;  %s3953_s24 = sshll.u32 %s4018_s7, 4  ;;  %s3954_s24 = int_to_ptr.vmem [resolvable:$false] %s3953_s24 }
  0x22   : > { %v2738_v61 = vld [vmem:[%s4984_s3 + $0x160] sm:$0xff]  ;;  %p3952_p13 = pneg %p3951_p12  ;;  %s3955_s25 = scalar_lea.vmem %s3954_s24, 32 }
  0x23   : > { %327 = vperm.xlu0 %3812, %v305_v5   ;;  %p3956_p0 = scmp.lt.s32.totalorder %s4941_s18, %s3954_s24  ;;  %p3957_p1 = scmp.lt.s32.totalorder %s3955_s25, %s3949_s23 }
  0x24   : > { %3805 = vset.pattern.permute.xlu1 %v4014_v8 }
  0x25   : > { %342 = vperm.xlu1 %3805, %v308_v9   ;;  %p3958_p2 = por %p3957_p1, %p3956_p0 }
  0x27   : > { %332 = vperm.xlu0 %3812, %v306_v1   ;;  %p3959_p3 = pnand %p3958_p2, %p3952_p13 }
  0x29   : > { %3806 = vset.pattern.permute.xlu1 %v4013_v3 }
  0x2a   : > { %437 = vperm.xlu1 %3806, %v308_v9  }
  0x2b   : > { %347 = vperm.xlu0 %3812, %v309_v10  }
  0x2e   : > { %441 = vperm.xlu1 %3806, %v309_v10  }
  0x2f   : > { %352 = vperm.xlu0 %3812, %v310_v4  }
  0x32   : > { %3807 = vset.pattern.permute.xlu1 %v4014_v8 }
  0x33   : > { %367 = vperm.xlu0 %3812, %v313_v11   ;;  %357 = vperm.xlu1 %3807, %v311_v12  }
  0x37   : > { %372 = vperm.xlu0 %3812, %v314_v6   ;;  %3808 = vset.pattern.permute.xlu1 %v4013_v3 }
  0x38   : > { %449 = vperm.xlu1 %3808, %v311_v12  }
  0x3b   : > { %387 = vperm.xlu0 %3812, %v317_v13  }
  0x3c   : > { %3809 = vset.pattern.permute.xlu1 %v4014_v8 }
  0x3d   : > { %362 = vperm.xlu1 %3809, %v312_v14  }
  0x3f   : > { %392 = vperm.xlu0 %3812, %v318_v15  }
  0x41   : > { %3810 = vset.pattern.permute.xlu1 %v4013_v3 }
  0x42   : > { %453 = vperm.xlu1 %3810, %v312_v14   ;;  %v1439_v14 = vld [vmem:[%s4986_s5] sm:$0xff] }
  0x43   : > { %3817 = vset.pattern.permute.xlu0 %v4013_v3 }
  0x44   : > { %477 = vperm.xlu0 %3817, %v318_v15  }
  0x46   : > { %457 = vperm.xlu1 %3810, %v313_v11  }
  0x48   : > { %3820 = vset.pattern.permute.xlu0 %v4014_v8 }
  0x49   : > { %639 = vperm.xlu0 %3820, %v617_v16  }
  0x4a   : > { %3811 = vset.pattern.permute.xlu1 %v4014_v8 }
  0x4b   : > { %377 = vperm.xlu1 %3811, %v315_v17  }
  0x4d   : > { %654 = vperm.xlu0 %3820, %v620_v18  }
  0x4f   : > { %3813 = vset.pattern.permute.xlu1 %v4013_v3 }
  0x50   : > { %465 = vperm.xlu1 %3813, %v315_v17  }
  0x51   : > { %664 = vperm.xlu0 %3820, %v622_v19  }
  0x54   : > { %3814 = vset.pattern.permute.xlu1 %v4014_v8 }
  0x55   : > { %382 = vperm.xlu1 %3814, %v316_v20   ;;  %674 = vperm.xlu0 %3820, %v624_v21  }
  0x59   : > { %3815 = vset.pattern.permute.xlu1 %v4013_v3  ;;  %684 = vperm.xlu0 %3820, %v626_v22  }
  0x5a   : > { %469 = vperm.xlu1 %3815, %v316_v20  }
  0x5d   : > { %694 = vperm.xlu0 %3820, %v628_v23  }
  0x5e   : > { %473 = vperm.xlu1 %3815, %v317_v13   ;;  %v2705_v13 = vld [vmem:[%s4984_s3 + $0xd8] sm:$0xff] }
  0x61   : > { %704 = vperm.xlu0 %3820, %v630_v24   ;;  %v2707_v24 = vld [vmem:[%s4984_s3 + $0xe8] sm:$0xff] }
  0x62   : > { %3816 = vset.pattern.permute.xlu1 %v4014_v8 }
  0x63   : > { %397 = vperm.xlu1 %3816, %v319_v25  }
  0x65   : > { %909 = vperm.xlu0 %3820, %v2694_v26  }
  0x67   : > { %3818 = vset.pattern.permute.xlu1 %v4013_v3  ;;  %v2740_v3 = vld [vmem:[%s4984_s3 + $0x170] sm:$0xff] }
  0x68   : > { %481 = vperm.xlu1 %3818, %v319_v25   ;;  %v1441_v25 = vld [vmem:[%s4986_s5 + $0x10] sm:$0xff] }
  0x69   : > { %919 = vperm.xlu0 %3820, %v2696_v27  }
  0x6c   : > { %3819 = vset.pattern.permute.xlu1 %v4014_v8 }
  0x6d   : > { %634 = vperm.xlu1 %3819, %v616_v28   ;;  %929 = vperm.xlu0 %3820, %v2698_v29  }
  0x71   : > { %644 = vperm.xlu1 %3819, %v618_v30   ;;  %939 = vperm.xlu0 %3820, %v2700_v31  }
  0x75   : > { %649 = vperm.xlu1 %3819, %v619_v32   ;;  %949 = vperm.xlu0 %3820, %v2702_v33  }
  0x79   : > { %659 = vperm.xlu1 %3819, %v621_v34   ;;  %959 = vperm.xlu0 %3820, %v2704_v35  }
  0x7d   : > { %669 = vperm.xlu1 %3819, %v623_v36   ;;  %969 = vperm.xlu0 %3820, %v2706_v37   ;;  %v2709_v37 = vld [vmem:[%s4984_s3 + $0xf8] sm:$0xff] }
  0x81   : > { %679 = vperm.xlu1 %3819, %v625_v38   ;;  %979 = vperm.xlu0 %3820, %v2708_v39   ;;  %v1443_v38 = vld [vmem:[%s4986_s5 + $0x20] sm:$0xff] }
  0x85   : > { %689 = vperm.xlu1 %3819, %v627_v41   ;;  %1184 = vperm.xlu0 %3820, %v2726_v42  }
  0x89   : > { %699 = vperm.xlu1 %3819, %v629_v43   ;;  %1194 = vperm.xlu0 %3820, %v2728_v44  }
  0x8d   : > { %709 = vperm.xlu1 %3819, %v631_v45   ;;  %1204 = vperm.xlu0 %3820, %v2730_v46  }
  0x91   : > { %v422_v49 = vpop.permute.xlu1 %421  ;;  %v430_v50 = vpop.permute.xlu0 %429  ;;  %914 = vperm.xlu1 %3819, %v2695_v47   ;;  %1214 = vperm.xlu0 %3820, %v2732_v48  }
  0x92   : > { %v488_v63 = vsub.f32 %v422_v49, %v4294_v58  ;;  %v490_v15 = vsub.f32 %v430_v50, %v4294_v58 }
  0x94   : > { %v520_v7 = vmul.f32 %v488_v63, %v488_v63  ;;  %v522_v26 = vmul.f32 %v490_v15, %v490_v15 }
  0x95   : > { %v426_v53 = vpop.permute.xlu1 %425  ;;  %v4281_v54 = vpop.permute.xlu0 %445  ;;  %924 = vperm.xlu1 %3819, %v2697_v51   ;;  %1224 = vperm.xlu0 %3820, %v2734_v52   ;;  %v2727_v52 = vld [vmem:[%s4984_s3 + $0x108] sm:$0xff] }
  0x96   : > { %v489_v8 = vsub.f32 %v426_v53, %v4294_v58  ;;  %v494_v45 = vsub.f32 %v4281_v54, %v4294_v58  ;;  %v1445_v53 = vld [vmem:[%s4986_s5 + $0x30] sm:$0xff] }
  0x98   : > { %v521_v20 = vmul.f32 %v489_v8, %v489_v8 }
  0x99   : > { %v4292_v57 = vpop.permute.xlu0 %461  ;;  %934 = vperm.xlu1 %3819, %v2699_v55   ;;  %1234 = vperm.xlu0 %3820, %v2736_v56  }
  0x9a   : > { %v338_v59 = vpop.permute.xlu1 %337 }
  0x9b   : > { %v407_v0 = vsub.f32 %v338_v59, %v4302_v62 }
  0x9d   : > { %944 = vperm.xlu1 %3819, %v2701_v60   ;;  %1244 = vperm.xlu0 %3820, %v2738_v61   ;;  %v507_v10 = vmul.f32 %v407_v0, %v407_v0  ;;  %v526_v60 = vmul.f32 %v494_v45, %v494_v45 }
  0x9e   : > { %v323_v1 = vpop.permute.xlu0 %322 }
  0x9f   : > { %v404_v4 = vsub.f32 %v323_v1, %v4302_v62  ;;  %v434_v5 = vpop.permute.xlu1 %433  ;;  %v2729_v1 = vld [vmem:[%s4984_s3 + $0x118] sm:$0xff] }
  0xa0   : > { %v491_v6 = vsub.f32 %v434_v5, %v4294_v58 }
  0xa1   : > { %v504_v9 = vmul.f32 %v404_v4, %v404_v4  ;;  %954 = vperm.xlu1 %3819, %v2703_v2   ;;  %1254 = vperm.xlu0 %3820, %v2740_v3   ;;  %v1447_v2 = vld [vmem:[%s4986_s5 + $0x40] sm:$0xff] }
  0xa2   : > { %v523_v11 = vmul.f32 %v491_v6, %v491_v6  ;;  %v328_v12 = vpop.permute.xlu0 %327 }
  0xa3   : > { %v536_v16 = vadd.f32 %v520_v7, %v504_v9  ;;  %v405_v17 = vsub.f32 %v328_v12, %v4302_v62  ;;  %v2731_v9 = vld [vmem:[%s4984_s3 + $0x128] sm:$0xff] }
  0xa4   : > { %v539_v18 = vadd.f32 %v523_v11, %v507_v10  ;;  %v343_v19 = vpop.permute.xlu1 %342  ;;  %v1449_v10 = vld [vmem:[%s4986_s5 + $0x50] sm:$0xff] }
  0xa5   : > { %v552_v21 = vmul.f32 -1.0, %v536_v16  ;;  %v505_v22 = vmul.f32 %v405_v17, %v405_v17  ;;  %964 = vperm.xlu1 %3819, %v2705_v13   ;;  %1457 = vperm.xlu0 %3820, %v1439_v14   ;;  %v408_v31 = vsub.f32 %v343_v19, %v4302_v62  ;;  %v2733_v19 = vld [vmem:[%s4984_s3 + $0x138] sm:$0xff] }
  0xa6   : > { %v333_v23 = vpop.permute.xlu0 %332  ;;  %v555_v30 = vmul.f32 -1.0, %v539_v18 }
  0xa7   : > { %v537_v27 = vadd.f32 %v521_v20, %v505_v22  ;;  %v406_v28 = vsub.f32 %v333_v23, %v4302_v62  ;;  %v568_v29 = vmul.f32 1.442695, %v552_v21  ;;  %v508_v43 = vmul.f32 %v408_v31, %v408_v31  ;;  %v1451_v20 = vld [vmem:[%s4986_s5 + $0x60] sm:$0xff] }
  0xa8   : > { %v574_v42 = vmul.f32 1.442695, %v555_v30 }
  0xa9   : > { %v553_v32 = vmul.f32 -1.0, %v537_v27  ;;  %v506_v33 = vmul.f32 %v406_v28, %v406_v28  ;;  %v438_v34 = vpop.permute.xlu1 %437  ;;  %974 = vperm.xlu1 %3819, %v2707_v24   ;;  %1467 = vperm.xlu0 %3820, %v1441_v25   ;;  %3821 = vpow2.f32 %v568_v29  ;;  %v2735_v28 = vld [vmem:[%s4984_s3 + $0x148] sm:$0xff]  ;;  %v1453_v29 = vld [vmem:[%s4986_s5 + $0x70] sm:$0xff] }
  0xaa   : > { %v492_v35 = vsub.f32 %v438_v34, %v4294_v58  ;;  %v348_v36 = vpop.permute.xlu0 %347 }
  0xab   : > { %v570_v39 = vmul.f32 1.442695, %v553_v32  ;;  %v538_v40 = vadd.f32 %v522_v26, %v506_v33  ;;  %v409_v41 = vsub.f32 %v348_v36, %v4302_v62 }
  0xac   : > { %v524_v44 = vmul.f32 %v492_v35, %v492_v35 }
  0xad   : > { %3823 = vpow2.f32 %v570_v39  ;;  %v554_v46 = vmul.f32 -1.0, %v538_v40  ;;  %v442_v47 = vpop.permute.xlu1 %441  ;;  %984 = vperm.xlu1 %3819, %v2709_v37   ;;  %1477 = vperm.xlu0 %3820, %v1443_v38   ;;  %v509_v49 = vmul.f32 %v409_v41, %v409_v41  ;;  %v2737_v37 = vld [vmem:[%s4984_s3 + $0x158] sm:$0xff]  ;;  %v2758_v39 = vld [vmem:[%s4986_s5 + $0x80] sm:$0xff] }
  0xae   : > { %v540_v48 = vadd.f32 %v524_v44, %v508_v43  ;;  %v493_v50 = vsub.f32 %v442_v47, %v4294_v58  ;;  %v353_v51 = vpop.permute.xlu0 %352  ;;  %3825 = vpow2.f32 %v574_v42  ;;  %v498_v43 = vsub.f32 %v4292_v57, %v4294_v58 }
  0xaf   : > { %v572_v55 = vmul.f32 1.442695, %v554_v46  ;;  %v410_v54 = vsub.f32 %v353_v51, %v4302_v62 }
  0xb0   : > { %v556_v56 = vmul.f32 -1.0, %v540_v48  ;;  %v525_v59 = vmul.f32 %v493_v50, %v493_v50  ;;  %v2739_v48 = vld [vmem:[%s4984_s3 + $0x168] sm:$0xff] }
  0xb1   : > { %3827 = vpow2.f32 %v572_v55  ;;  %v510_v61 = vmul.f32 %v410_v54, %v410_v54  ;;  %1189 = vperm.xlu1 %3819, %v2727_v52   ;;  %1487 = vperm.xlu0 %3820, %v1445_v53   ;;  %v530_v52 = vmul.f32 %v498_v43, %v498_v43 }
  0xb2   : > { %v541_v63 = vadd.f32 %v525_v59, %v509_v49  ;;  %v358_v0 = vpop.permute.xlu1 %357  ;;  %v576_v3 = vmul.f32 1.442695, %v556_v56  ;;  %v368_v22 = vpop.permute.xlu0 %367  ;;  %v2760_v49 = vld [vmem:[%s4986_s5 + $0x90] sm:$0xff]  ;;  %v2741_v56 = vld [vmem:[%s4984_s3 + $0x178] sm:$0xff] }
  0xb3   : > { %v542_v5 = vadd.f32 %v526_v60, %v510_v61  ;;  %v3822_v6 = vpop.eup %3821  ;;  %v411_v8 = vsub.f32 %v358_v0, %v4302_v62  ;;  %v413_v40 = vsub.f32 %v368_v22, %v4302_v62  ;;  %v2762_v61 = vld [vmem:[%s4986_s5 + $0xa0] sm:$0xff] }
  0xb4   : > { %v557_v4 = vmul.f32 -1.0, %v541_v63  ;;  %3829 = vpow2.f32 %v576_v3 }
  0xb5   : > { %1199 = vperm.xlu1 %3819, %v2729_v1   ;;  %1497 = vperm.xlu0 %3820, %v1447_v2   ;;  %v558_v15 = vmul.f32 -1.0, %v542_v5  ;;  %v511_v17 = vmul.f32 %v411_v8, %v411_v8  ;;  %v513_v50 = vmul.f32 %v413_v40, %v413_v40  ;;  %v2764_v8 = vld [vmem:[%s4986_s5 + $0xb0] sm:$0xff]  ;;  %v1448_v40 = vld [vmem:[%s4986_s5 + $0x48] sm:$0xff] }
  0xb6   : > { %v578_v7 = vmul.f32 1.442695, %v557_v4  ;;  %v373_v35 = vpop.permute.xlu0 %372 }
  0xb7   : > { %v3824_v11 = vpop.eup %3823  ;;  %v450_v12 = vpop.permute.xlu1 %449  ;;  %v580_v26 = vmul.f32 1.442695, %v558_v15  ;;  %v414_v44 = vsub.f32 %v373_v35, %v4302_v62 }
  0xb8   : > { %3831 = vpow2.f32 %v578_v7  ;;  %v495_v13 = vsub.f32 %v450_v12, %v4294_v58  ;;  %v3509_v14 = vpack.c.bf16 %v3824_v11, %v3822_v6  ;;  %v3826_v16 = vpop.eup %3825  ;;  %v1440_v6 = vld [vmem:[%s4986_s5 + $0x8] sm:$0xff] }
  0xb9   : > { %1209 = vperm.xlu1 %3819, %v2731_v9   ;;  %1507 = vperm.xlu0 %3820, %v1449_v10   ;;  %3833 = vpow2.f32 %v580_v26  ;;  %v514_v53 = vmul.f32 %v414_v44, %v414_v44 }
  0xba   : > { %v527_v18 = vmul.f32 %v495_v13, %v495_v13  ;;  %3510 = vmatprep.subr.bf16.mxu0 %v3509_v14  ;;  %v388_v3 = vpop.permute.xlu0 %387  ;;  %v1442_v13 = vld [vmem:[%s4986_s5 + $0x18] sm:$0xff] }
  0xbb   : > { %v3828_v21 = vpop.eup %3827  ;;  %3512 = vmatpush3.bf16.msra.mxu0 %v3509_v14  ;;  %v546_v1 = vadd.f32 %v530_v52, %v514_v53  ;;  %v2766_v14 = vld [vmem:[%s4986_s5 + $0xc0] sm:$0xff] }
  0xbc   : > { %v543_v23 = vadd.f32 %v527_v18, %v511_v17  ;;  %v363_v24 = vpop.permute.xlu1 %362  ;;  %v3513_v25 = vpack.c.bf16 %v3826_v16, %v3828_v21  ;;  %v2768_v21 = vld [vmem:[%s4986_s5 + $0xd0] sm:$0xff] }
  0xbd   : > { %1219 = vperm.xlu1 %3819, %v2733_v19   ;;  %1517 = vperm.xlu0 %3820, %v1451_v20   ;;  %v412_v31 = vsub.f32 %v363_v24, %v4302_v62  ;;  %v562_v10 = vmul.f32 -1.0, %v546_v1  ;;  %v1444_v20 = vld [vmem:[%s4986_s5 + $0x28] sm:$0xff] }
  0xbe   : > { %v559_v27 = vmul.f32 -1.0, %v543_v23  ;;  %3514 = vmatprep.subr.bf16.mxu0 %v3513_v25  ;;  %v3830_v32 = vpop.eup %3829  ;;  %v393_v15 = vpop.permute.xlu0 %392 }
  0xbf   : > { %3516 = vmatpush3.bf16.msra.mxu0 %v3513_v25  ;;  %v512_v41 = vmul.f32 %v412_v31, %v412_v31  ;;  %v588_v18 = vmul.f32 1.442695, %v562_v10  ;;  %v2770_v31 = vld [vmem:[%s4986_s5 + $0xe0] sm:$0xff]  ;;  %v418_v35 = vsub.f32 %v393_v15, %v4302_v62  ;;  %v2763_v15 = vld [vmem:[%s4986_s5 + $0xa8] sm:$0xff] }
  0xc0   : > { %v582_v30 = vmul.f32 1.442695, %v559_v27 }
  0xc1   : > { %v454_v33 = vpop.permute.xlu1 %453  ;;  %1229 = vperm.xlu1 %3819, %v2735_v28   ;;  %1527 = vperm.xlu0 %3820, %v1453_v29   ;;  %v1446_v29 = vld [vmem:[%s4986_s5 + $0x38] sm:$0xff] }
  0xc2   : > { %v3832_v34 = vpop.eup %3831  ;;  %3835 = vpow2.f32 %v582_v30  ;;  %v496_v36 = vsub.f32 %v454_v33, %v4294_v58 }
  0xc3   : > { %v3517_v38 = vpack.c.bf16 %v3832_v34, %v3830_v32  ;;  %v3834_v59 = vpop.eup %3833  ;;  %v478_v27 = vpop.permute.xlu0 %477  ;;  %v417_v32 = vsub.f32 %v388_v3, %v4302_v62  ;;  %v1454_v3 = vld [vmem:[%s4986_s5 + $0x78] sm:$0xff] }
  0xc4   : > { %v528_v42 = vmul.f32 %v496_v36, %v496_v36  ;;  %v502_v36 = vsub.f32 %v478_v27, %v4294_v58  ;;  %v2769_v27 = vld [vmem:[%s4986_s5 + $0xd8] sm:$0xff] }
  0xc5   : > { %v458_v45 = vpop.permute.xlu1 %457  ;;  %3518 = vmatprep.subr.bf16.mxu0 %v3517_v38  ;;  %1239 = vperm.xlu1 %3819, %v2737_v37  }
  0xc6   : > { %v544_v46 = vadd.f32 %v528_v42, %v512_v41  ;;  %v497_v47 = vsub.f32 %v458_v45, %v4294_v58  ;;  %3520 = vmatpush3.bf16.msra.mxu0 %v3517_v38  ;;  %1732 = vperm.xlu0 %3820, %v2758_v39   ;;  %v2772_v41 = vld [vmem:[%s4986_s5 + $0xf0] sm:$0xff]  ;;  %v517_v42 = vmul.f32 %v417_v32, %v417_v32 }
  0xc7   : > { %v518_v45 = vmul.f32 %v418_v35, %v418_v35  ;;  %v2824_v32 = vld [vmem:[%s4986_s5 + $0x190] sm:$0xff] }
  0xc8   : > { %v560_v57 = vmul.f32 -1.0, %v544_v46  ;;  %v529_v51 = vmul.f32 %v497_v47, %v497_v47  ;;  %v534_v46 = vmul.f32 %v502_v36, %v502_v36  ;;  %v606_v35 = vld [vmem:[%s4983_s2 + $0x30] sm:$0xff]  ;;  %v2773_v36 = vld [vmem:[%s4986_s5 + $0xf8] sm:$0xff] }
  0xc9   : > { %1249 = vperm.xlu1 %3819, %v2739_v48  }
  0xca   : > { %v545_v55 = vadd.f32 %v529_v51, %v513_v50  ;;  %v378_v54 = vpop.permute.xlu1 %377  ;;  %1742 = vperm.xlu0 %3820, %v2760_v49   ;;  %v584_v60 = vmul.f32 1.442695, %v560_v57  ;;  %v1450_v49 = vld [vmem:[%s4986_s5 + $0x58] sm:$0xff]  ;;  %v2790_v51 = vld [vmem:[%s4986_s5 + $0x100] sm:$0xff] }
  0xcb   : > { %v415_v5 = vsub.f32 %v378_v54, %v4302_v62 }
  0xcc   : > { %v3836_v63 = vpop.eup %3835  ;;  %v561_v0 = vmul.f32 -1.0, %v545_v55  ;;  %3837 = vpow2.f32 %v584_v60  ;;  %v550_v55 = vadd.f32 %v534_v46, %v518_v45  ;;  %v1452_v60 = vld [vmem:[%s4986_s5 + $0x68] sm:$0xff]  ;;  %v2793_v45 = vld [vmem:[%s4986_s5 + $0x118] sm:$0xff]  ;;  %v2830_v46 = vld [vmem:[%s4986_s5 + $0x1c0] sm:$0xff] }
  0xcd   : > { %v3521_v2 = vpack.c.bf16 %v3836_v63, %v3834_v59  ;;  %1259 = vperm.xlu1 %3819, %v2741_v56   ;;  %v515_v11 = vmul.f32 %v415_v5, %v415_v5  ;;  %v2792_v63 = vld [vmem:[%s4986_s5 + $0x110] sm:$0xff] }
  0xce   : > { %v586_v4 = vmul.f32 1.442695, %v561_v0  ;;  %1752 = vperm.xlu0 %3820, %v2762_v61   ;;  %v566_v1 = vmul.f32 -1.0, %v550_v55  ;;  %v2797_v55 = vld [vmem:[%s4986_s5 + $0x138] sm:$0xff] }
  0xcf   : > { %v466_v7 = vpop.permute.xlu1 %465  ;;  %3522 = vmatprep.subr.bf16.mxu0 %v3521_v2 }
  0xd0   : > { %3839 = vpow2.f32 %v586_v4  ;;  %v499_v9 = vsub.f32 %v466_v7, %v4294_v58  ;;  %3524 = vmatpush3.bf16.msra.mxu0 %v3521_v2  ;;  %v2794_v4 = vld [vmem:[%s4986_s5 + $0x120] sm:$0xff] }
  0xd1   : > { %1462 = vperm.xlu1 %3819, %v1440_v6   ;;  %3841 = vpow2.f32 %v588_v18  ;;  %v596_v6 = vmul.f32 1.442695, %v566_v1  ;;  %v2522_v1 = vld [vmem:[#allocation2] sm:$0x1] }
  0xd2   : > { %v531_v12 = vmul.f32 %v499_v9, %v499_v9  ;;  %1762 = vperm.xlu0 %3820, %v2764_v8   ;;  %v2796_v8 = vld [vmem:[%s4986_s5 + $0x130] sm:$0xff] }
  0xd4   : > { %v547_v16 = vadd.f32 %v531_v12, %v515_v11  ;;  %v383_v17 = vpop.permute.xlu1 %382  ;;  %v2761_v12 = vld [vmem:[%s4986_s5 + $0x98] sm:$0xff] }
  0xd5   : > { %1472 = vperm.xlu1 %3819, %v1442_v13   ;;  %v416_v23 = vsub.f32 %v383_v17, %v4302_v62  ;;  %v2765_v17 = vld [vmem:[%s4986_s5 + $0xb8] sm:$0xff] }
  0xd6   : > { %v563_v19 = vmul.f32 -1.0, %v547_v16  ;;  %1772 = vperm.xlu0 %3820, %v2766_v14   ;;  %v3838_v24 = vpop.eup %3837  ;;  %v2798_v14 = vld [vmem:[%s4986_s5 + $0x140] sm:$0xff]  ;;  %v2800_v16 = vld [vmem:[%s4986_s5 + $0x150] sm:$0xff] }
  0xd7   : > { %v516_v33 = vmul.f32 %v416_v23, %v416_v23  ;;  %v2804_v23 = vld [vmem:[%s4986_s5 + $0x170] sm:$0xff] }
  0xd8   : > { %v590_v22 = vmul.f32 1.442695, %v563_v19  ;;  %v2802_v19 = vld [vmem:[%s4986_s5 + $0x160] sm:$0xff] }
  0xd9   : > { %v470_v25 = vpop.permute.xlu1 %469  ;;  %1482 = vperm.xlu1 %3819, %v1444_v20  }
  0xda   : > { %v3840_v26 = vpop.eup %3839  ;;  %3843 = vpow2.f32 %v590_v22  ;;  %v500_v28 = vsub.f32 %v470_v25, %v4294_v58  ;;  %1782 = vperm.xlu0 %3820, %v2768_v21   ;;  %v2767_v22 = vld [vmem:[%s4986_s5 + $0xc8] sm:$0xff]  ;;  %v602_v25 = vld [vmem:[%s4983_s2 + $0x10] sm:$0xff] }
  0xdb   : > { %v3525_v30 = vpack.c.bf16 %v3840_v26, %v3838_v24  ;;  %v3842_v50 = vpop.eup %3841  ;;  %v601_v24 = vld [vmem:[%s4983_s2 + $0x8] sm:$0xff]  ;;  %v4494_v26 = vpop.permute.xlu0 %639 }
  0xdc   : > { %v532_v34 = vmul.f32 %v500_v28, %v500_v28  ;;  %v2822_v28 = vld [vmem:[%s4986_s5 + $0x180] sm:$0xff] }
  0xdd   : > { %v474_v37 = vpop.permute.xlu1 %473  ;;  %3526 = vmatprep.subr.bf16.mxu0 %v3525_v30  ;;  %1492 = vperm.xlu1 %3819, %v1446_v29   ;;  %v603_v29 = vld [vmem:[%s4983_s2 + $0x18] sm:$0xff] }
  0xde   : > { %v548_v38 = vadd.f32 %v532_v34, %v516_v33  ;;  %v501_v39 = vsub.f32 %v474_v37, %v4294_v58  ;;  %3528 = vmatpush3.bf16.msra.mxu0 %v3525_v30  ;;  %1792 = vperm.xlu0 %3820, %v2770_v31   ;;  %v604_v30 = vld [vmem:[%s4983_s2 + $0x20] sm:$0xff]  ;;  %v2771_v31 = vld [vmem:[%s4986_s5 + $0xe8] sm:$0xff] }
  0xdf   : > { %v4514_v33 = vpop.permute.xlu0 %654  ;;  %v605_v34 = vld [vmem:[%s4983_s2 + $0x28] sm:$0xff]  ;;  %v2826_v37 = vld [vmem:[%s4986_s5 + $0x1a0] sm:$0xff] }
  0xe0   : > { %v564_v43 = vmul.f32 -1.0, %v548_v38  ;;  %v533_v44 = vmul.f32 %v501_v39, %v501_v39  ;;  %v607_v38 = vld [vmem:[%s4983_s2 + $0x38] sm:$0xff]  ;;  %v608_v39 = vld [vmem:[%s4983_s2 + $0x40] sm:$0xff] }
  0xe1   : > { %1502 = vperm.xlu1 %3819, %v1448_v40  }
  0xe2   : > { %v549_v47 = vadd.f32 %v533_v44, %v517_v42  ;;  %v398_v48 = vpop.permute.xlu1 %397  ;;  %1802 = vperm.xlu0 %3820, %v2772_v41   ;;  %v592_v57 = vmul.f32 1.442695, %v564_v43  ;;  %v2791_v41 = vld [vmem:[%s4986_s5 + $0x108] sm:$0xff]  ;;  %v2828_v42 = vld [vmem:[%s4986_s5 + $0x1b0] sm:$0xff] }
  0xe3   : > { %v419_v59 = vsub.f32 %v398_v48, %v4302_v62  ;;  %v4534_v40 = vpop.permute.xlu0 %664  ;;  %v609_v43 = vld [vmem:[%s4983_s2 + $0x48] sm:$0xff]  ;;  %v610_v44 = vld [vmem:[%s4983_s2 + $0x50] sm:$0xff]  ;;  %v611_v48 = vld [vmem:[%s4983_s2 + $0x58] sm:$0xff] }
  0xe4   : > { %v3844_v52 = vpop.eup %3843  ;;  %v565_v53 = vmul.f32 -1.0, %v549_v47  ;;  %3845 = vpow2.f32 %v592_v57  ;;  %v2832_v57 = vld [vmem:[%s4986_s5 + $0x1d0] sm:$0xff] }
  0xe5   : > { %v3529_v54 = vpack.c.bf16 %v3844_v52, %v3842_v50  ;;  %1512 = vperm.xlu1 %3819, %v1450_v49   ;;  %v519_v2 = vmul.f32 %v419_v59, %v419_v59  ;;  %v612_v49 = vld [vmem:[%s4983_s2 + $0x60] sm:$0xff]  ;;  %v2795_v50 = vld [vmem:[%s4986_s5 + $0x128] sm:$0xff]  ;;  %v614_v52 = vld [vmem:[%s4983_s2 + $0x70] sm:$0xff] }
  0xe6   : > { %v594_v56 = vmul.f32 1.442695, %v565_v53  ;;  %2007 = vperm.xlu0 %3820, %v2790_v51   ;;  %v613_v51 = vld [vmem:[%s4983_s2 + $0x68] sm:$0xff] }
  0xe7   : > { %v482_v61 = vpop.permute.xlu1 %481  ;;  %3530 = vmatprep.subr.bf16.mxu0 %v3529_v54  ;;  %v4554_v47 = vpop.permute.xlu0 %674  ;;  %v2799_v59 = vld [vmem:[%s4986_s5 + $0x148] sm:$0xff] }
  0xe8   : > { %3847 = vpow2.f32 %v594_v56  ;;  %v503_v0 = vsub.f32 %v482_v61, %v4294_v58  ;;  %3532 = vmatpush3.bf16.msra.mxu0 %v3529_v54  ;;  %v2759_v58 = vld [vmem:[%s4986_s5 + $0x88] sm:$0xff]  ;;  %v2834_v54 = vld [vmem:[%s4986_s5 + $0x1e0] sm:$0xff]  ;;  %v615_v56 = vld [vmem:[%s4983_s2 + $0x78] sm:$0xff] }
  0xe9   : > { %1522 = vperm.xlu1 %3819, %v1452_v60   ;;  %3849 = vpow2.f32 %v596_v6  ;;  %v2836_v60 = vld [vmem:[%s4986_s5 + $0x1f0] sm:$0xff] }
  0xea   : > { %v535_v62 = vmul.f32 %v503_v0, %v503_v0  ;;  %2017 = vperm.xlu0 %3820, %v2792_v63   ;;  %v2801_v63 = vld [vmem:[%s4986_s5 + $0x158] sm:$0xff] }
  0xeb   : > { %v4574_v53 = vpop.permute.xlu0 %684 }
  0xec   : > { %v551_v5 = vadd.f32 %v535_v62, %v519_v2  ;;  %v635_v0 = vpop.permute.xlu1 %634  ;;  %v2803_v62 = vld [vmem:[%s4986_s5 + $0x168] sm:$0xff] }
  0xed   : > { %1532 = vperm.xlu1 %3819, %v1454_v3  }
  0xee   : > { %v567_v7 = vmul.f32 -1.0, %v551_v5  ;;  %2027 = vperm.xlu0 %3820, %v2794_v4   ;;  %v3846_v10 = vpop.eup %3845  ;;  %v2805_v4 = vld [vmem:[%s4986_s5 + $0x178] sm:$0xff]  ;;  %v2823_v5 = vld [vmem:[%s4986_s5 + $0x188] sm:$0xff] }
  0xef   : > { %v4591_v61 = vpop.permute.xlu0 %694 }
  0xf0   : > { %v598_v9 = vmul.f32 1.442695, %v567_v7  ;;  %v645_v3 = vpop.permute.xlu1 %644  ;;  %v2825_v7 = vld [vmem:[%s4986_s5 + $0x198] sm:$0xff] }
  0xf1   : > { %1737 = vperm.xlu1 %3819, %v2759_v58  }
  0xf2   : > { %v3848_v11 = vpop.eup %3847  ;;  %3851 = vpow2.f32 %v598_v9  ;;  %2037 = vperm.xlu0 %3820, %v2796_v8   ;;  %v2827_v8 = vld [vmem:[%s4986_s5 + $0x1a8] sm:$0xff]  ;;  %v2829_v9 = vld [vmem:[%s4986_s5 + $0x1b8] sm:$0xff] }
  0xf3   : > { %v3533_v13 = vpack.c.bf16 %v3848_v11, %v3846_v10  ;;  %v3850_v18 = vpop.eup %3849  ;;  %v4596_v2 = vpop.permute.xlu0 %704  ;;  %v2831_v11 = vld [vmem:[%s4986_s5 + $0x1c8] sm:$0xff] }
  0xf4   : > { %v650_v6 = vpop.permute.xlu1 %649 }
  0xf5   : > { %3534 = vmatprep.subr.bf16.mxu0 %v3533_v13  ;;  %1747 = vperm.xlu1 %3819, %v2761_v12  }
  0xf6   : > { %3536 = vmatpush3.bf16.msra.mxu0 %v3533_v13  ;;  %2047 = vperm.xlu0 %3820, %v2798_v14   ;;  %v2833_v13 = vld [vmem:[%s4986_s5 + $0x1d8] sm:$0xff]  ;;  %v2835_v14 = vld [vmem:[%s4986_s5 + $0x1e8] sm:$0xff] }
  0xf8   : > { %v660_v58 = vpop.permute.xlu1 %659 }
  0xf9   : > { %1757 = vperm.xlu1 %3819, %v2763_v15  }
  0xfa   : > { %2057 = vperm.xlu0 %3820, %v2800_v16   ;;  %v2837_v16 = vld [vmem:[%s4986_s5 + $0x1f8] sm:$0xff] }
  0xfc   : > { %v3852_v20 = vpop.eup %3851  ;;  %v670_v10 = vpop.permute.xlu1 %669 }
  0xfd   : > { %v3537_v21 = vpack.c.bf16 %v3852_v20, %v3850_v18  ;;  %1767 = vperm.xlu1 %3819, %v2765_v17   ;;  %v2678_v18 = vld [vmem:[%s4983_s2 + $0x80] sm:$0xff] }
  0xfe   : > { %2067 = vperm.xlu0 %3820, %v2802_v19   ;;  %3170 = vmatprep.mubr.f32.mxu1 %v2678_v18  ;;  %v2685_v18 = vld [vmem:[%s4983_s2 + $0xb8] sm:$0xff] }
  0xff   : > { %3538 = vmatprep.subr.bf16.mxu0 %v3537_v21 }
 0x100   : > { %3540 = vmatpush3.bf16.msra.mxu0 %v3537_v21  ;;  %v680_v12 = vpop.permute.xlu1 %679 }
 0x101   : > { %1777 = vperm.xlu1 %3819, %v2767_v22  }
 0x102   : > { %2077 = vperm.xlu0 %3820, %v2804_v23  }
 0x103   : > { %3115 = vmatmul.mubr.f32.vlgmr.msra.gmra.mrb[0].mxu0 %v601_v24 }
 0x104   : > { %3117 = vmatprep.mubr.f32.mxu0 %v602_v25  ;;  %v690_v15 = vpop.permute.xlu1 %689 }
 0x105   : > { %1787 = vperm.xlu1 %3819, %v2769_v27  }
 0x106   : > { %2282 = vperm.xlu0 %3820, %v2822_v28  }
 0x107   : > { %3118 = vmatmul.mubr.f32.gmra.mrb[2].mxu0 %v603_v29 }
 0x108   : > { %3120 = vmatprep.mubr.f32.mxu0 %v604_v30  ;;  %v700_v17 = vpop.permute.xlu1 %699 }
 0x109   : > { %1797 = vperm.xlu1 %3819, %v2771_v31  }
 0x10a   : > { %2292 = vperm.xlu0 %3820, %v2824_v32  }
 0x10b   : > { %3121 = vmatmul.mubr.f32.gmra.mrb[4].mxu0 %v605_v34 }
 0x10c   : > { %3123 = vmatprep.mubr.f32.mxu0 %v606_v35 }
 0x10d   : > { %1807 = vperm.xlu1 %3819, %v2773_v36  }
 0x10e   : > { %2302 = vperm.xlu0 %3820, %v2826_v37  }
 0x10f   : > { %3124 = vmatmul.mubr.f32.gmra.mrb[6].mxu0 %v607_v38 }
 0x110   : > { %3126 = vmatprep.mubr.f32.mxu0 %v608_v39 }
 0x111   : > { %2012 = vperm.xlu1 %3819, %v2791_v41  }
 0x112   : > { %2312 = vperm.xlu0 %3820, %v2828_v42  }
 0x113   : > { %3127 = vmatmul.mubr.f32.gmra.mrb[8].mxu0 %v609_v43 }
 0x114   : > { %3129 = vmatprep.mubr.f32.mxu0 %v610_v44 }
 0x115   : > { %2022 = vperm.xlu1 %3819, %v2793_v45  }
 0x116   : > { %2322 = vperm.xlu0 %3820, %v2830_v46  }
 0x117   : > { %3130 = vmatmul.mubr.f32.gmra.mrb[10].mxu0 %v611_v48 }
 0x118   : > { %3132 = vmatprep.mubr.f32.mxu0 %v612_v49 }
 0x119   : > { %2032 = vperm.xlu1 %3819, %v2795_v50  }
 0x11a   : > { %2332 = vperm.xlu0 %3820, %v2832_v57  }
 0x11b   : > { %3133 = vmatmul.mubr.f32.gmra.mrb[12].mxu0 %v613_v51 }
 0x11c   : > { %3135 = vmatprep.mubr.f32.mxu0 %v614_v52 }
 0x11d   : > { %2042 = vperm.xlu1 %3819, %v2797_v55  }
 0x11e   : > { %2342 = vperm.xlu0 %3820, %v2834_v54  }
 0x11f   : > { %3136 = vmatmul.mubr.f32.gmra.mrb[14].mxu0 %v615_v56 }
 0x121   : > { %2052 = vperm.xlu1 %3819, %v2799_v59  }
 0x122   : > { %2352 = vperm.xlu0 %3820, %v2836_v60  }
 0x125   : > { %2062 = vperm.xlu1 %3819, %v2801_v63   ;;  %v710_v63 = vpop.permute.xlu1 %709 }
 0x126   : > { %2525 = vperm.xlu0 %3820, %v2522_v1  }
 0x129   : > { %2072 = vperm.xlu1 %3819, %v2803_v62  }
 0x12d   : > { %2082 = vperm.xlu1 %3819, %v2805_v4  }
 0x131   : > { %2287 = vperm.xlu1 %3819, %v2823_v5  }
 0x135   : > { %2297 = vperm.xlu1 %3819, %v2825_v7  }
 0x139   : > { %2307 = vperm.xlu1 %3819, %v2827_v8  }
 0x13d   : > { %2317 = vperm.xlu1 %3819, %v2829_v9  }
 0x141   : > { %2327 = vperm.xlu1 %3819, %v2831_v11  }
 0x145   : > { %2337 = vperm.xlu1 %3819, %v2833_v13   ;;  %v2680_v13 = vld [vmem:[%s4983_s2 + $0x90] sm:$0xff] }
 0x149   : > { %2347 = vperm.xlu1 %3819, %v2835_v14   ;;  %v2681_v14 = vld [vmem:[%s4983_s2 + $0x98] sm:$0xff] }
 0x14d   : > { %2357 = vperm.xlu1 %3819, %v2837_v16   ;;  %v2683_v16 = vld [vmem:[%s4983_s2 + $0xa8] sm:$0xff] }
 0x1d6   : > { %v3116_v19 = vpop.f32.mrb[0].mxu0 }
 0x1d7   : > { %v784_v20 = vadd.f32 %v3116_v19, %v4494_v26  ;;  %v778_v21 = vpop.f32.mrb[1].mxu0  ;;  %v2686_v19 = vld [vmem:[%s4983_s2 + $0xc0] sm:$0xff] }
 0x1d8   : > { %v779_v22 = vadd.f32 %v778_v21, %v635_v0  ;;  %v2688_v21 = vld [vmem:[%s4983_s2 + $0xd0] sm:$0xff] }
 0x1d9   : > { %3853 = vtanh.f32 %v784_v20  ;;  %v2687_v20 = vld [vmem:[%s4983_s2 + $0xc8] sm:$0xff] }
 0x1da   : > { %3855 = vtanh.f32 %v779_v22  ;;  %v3119_v23 = vpop.f32.mrb[2].mxu0  ;;  %v2689_v22 = vld [vmem:[%s4983_s2 + $0xd8] sm:$0xff] }
 0x1db   : > { %v794_v24 = vadd.f32 %v3119_v23, %v650_v6  ;;  %v788_v25 = vpop.f32.mrb[3].mxu0  ;;  %v2690_v23 = vld [vmem:[%s4983_s2 + $0xe0] sm:$0xff] }
 0x1dc   : > { %v789_v27 = vadd.f32 %v788_v25, %v645_v3  ;;  %v2692_v25 = vld [vmem:[%s4983_s2 + $0xf0] sm:$0xff] }
 0x1dd   : > { %3857 = vtanh.f32 %v794_v24  ;;  %v2691_v24 = vld [vmem:[%s4983_s2 + $0xe8] sm:$0xff] }
 0x1de   : > { %3859 = vtanh.f32 %v789_v27  ;;  %v3122_v28 = vpop.f32.mrb[4].mxu0  ;;  %v2693_v27 = vld [vmem:[%s4983_s2 + $0xf8] sm:$0xff] }
 0x1df   : > { %v804_v29 = vadd.f32 %v3122_v28, %v660_v58  ;;  %v798_v30 = vpop.f32.mrb[5].mxu0  ;;  %v2710_v28 = vld [vmem:[%s4983_s2 + $0x100] sm:$0xff] }
 0x1e0   : > { %v799_v31 = vadd.f32 %v798_v30, %v4514_v33  ;;  %3226 = vmatprep.mubr.f32.mxu0 %v2710_v28  ;;  %v910_v30 = vpop.permute.xlu0 %909 }
 0x1e1   : > { %3861 = vtanh.f32 %v804_v29  ;;  %v915_v29 = vpop.permute.xlu1 %914 }
 0x1e2   : > { %3863 = vtanh.f32 %v799_v31  ;;  %v3125_v32 = vpop.f32.mrb[6].mxu0 }
 0x1e3   : > { %v3854_v34 = vpop.eup %3853  ;;  %v814_v26 = vadd.f32 %v3125_v32, %v670_v10  ;;  %v808_v35 = vpop.f32.mrb[7].mxu0 }
 0x1e4   : > { %v3856_v36 = vpop.eup %3855  ;;  %v809_v37 = vadd.f32 %v808_v35, %v4534_v40  ;;  %v920_v32 = vpop.permute.xlu0 %919 }
 0x1e5   : > { %3865 = vtanh.f32 %v814_v26  ;;  %v3541_v38 = vpack.c.bf16 %v3854_v34, %v3856_v36  ;;  %v925_v31 = vpop.permute.xlu1 %924 }
 0x1e6   : > { %3867 = vtanh.f32 %v809_v37  ;;  %v3128_v39 = vpop.f32.mrb[8].mxu0 }
 0x1e7   : > { %v3858_v41 = vpop.eup %3857  ;;  %v824_v42 = vadd.f32 %v3128_v39, %v680_v12  ;;  %v818_v43 = vpop.f32.mrb[9].mxu0  ;;  %3542 = vmatprep.subr.bf16.mxu1 %v3541_v38 }
 0x1e8   : > { %v3860_v44 = vpop.eup %3859  ;;  %v819_v33 = vadd.f32 %v818_v43, %v4554_v47  ;;  %3544 = vmatpush3.bf16.msra.mxu1 %v3541_v38  ;;  %v930_v26 = vpop.permute.xlu0 %929 }
 0x1e9   : > { %3869 = vtanh.f32 %v824_v42  ;;  %v3545_v45 = vpack.c.bf16 %v3858_v41, %v3860_v44  ;;  %v935_v34 = vpop.permute.xlu1 %934 }
 0x1ea   : > { %3871 = vtanh.f32 %v819_v33  ;;  %v3131_v46 = vpop.f32.mrb[10].mxu0 }
 0x1eb   : > { %v3862_v48 = vpop.eup %3861  ;;  %v834_v49 = vadd.f32 %v3131_v46, %v690_v15  ;;  %v828_v50 = vpop.f32.mrb[11].mxu0  ;;  %3546 = vmatprep.subr.bf16.mxu1 %v3545_v45  ;;  %v2682_v15 = vld [vmem:[%s4983_s2 + $0xa0] sm:$0xff] }
 0x1ec   : > { %v3864_v40 = vpop.eup %3863  ;;  %v829_v57 = vadd.f32 %v828_v50, %v4574_v53  ;;  %3548 = vmatpush3.bf16.msra.mxu1 %v3545_v45  ;;  %v940_v42 = vpop.permute.xlu0 %939 }
 0x1ed   : > { %3873 = vtanh.f32 %v834_v49  ;;  %v3549_v51 = vpack.c.bf16 %v3862_v48, %v3864_v40  ;;  %v945_v39 = vpop.permute.xlu1 %944 }
 0x1ee   : > { %3875 = vtanh.f32 %v829_v57  ;;  %v3134_v52 = vpop.f32.mrb[12].mxu0 }
 0x1ef   : > { %v3866_v55 = vpop.eup %3865  ;;  %v844_v54 = vadd.f32 %v3134_v52, %v700_v17  ;;  %v838_v47 = vpop.f32.mrb[13].mxu0  ;;  %3550 = vmatprep.subr.bf16.mxu1 %v3549_v51  ;;  %v2684_v17 = vld [vmem:[%s4983_s2 + $0xb0] sm:$0xff] }
 0x1f0   : > { %v3868_v56 = vpop.eup %3867  ;;  %v839_v59 = vadd.f32 %v838_v47, %v4591_v61  ;;  %3552 = vmatpush3.bf16.msra.mxu1 %v3549_v51  ;;  %v950_v40 = vpop.permute.xlu0 %949 }
 0x1f1   : > { %3877 = vtanh.f32 %v844_v54  ;;  %v3553_v60 = vpack.c.bf16 %v3866_v55, %v3868_v56  ;;  %v955_v49 = vpop.permute.xlu1 %954 }
 0x1f2   : > { %3879 = vtanh.f32 %v839_v59  ;;  %v3137_v0 = vpop.f32.mrb[14].mxu0 }
 0x1f3   : > { %v3870_v1 = vpop.eup %3869  ;;  %v854_v53 = vadd.f32 %v3137_v0, %v710_v63  ;;  %v848_v62 = vpop.f32.mrb[15].mxu0  ;;  %3554 = vmatprep.subr.bf16.mxu1 %v3553_v60 }
 0x1f4   : > { %v3872_v3 = vpop.eup %3871  ;;  %v849_v4 = vadd.f32 %v848_v62, %v4596_v2  ;;  %3556 = vmatpush3.bf16.msra.mxu1 %v3553_v60  ;;  %v2679_v2 = vld [vmem:[%s4983_s2 + $0x88] sm:$0xff]  ;;  %v960_v0 = vpop.permute.xlu0 %959 }
 0x1f5   : > { %3881 = vtanh.f32 %v854_v53  ;;  %v3557_v5 = vpack.c.bf16 %v3870_v1, %v3872_v3  ;;  %v965_v59 = vpop.permute.xlu1 %964 }
 0x1f6   : > { %3883 = vtanh.f32 %v849_v4 }
 0x1f7   : > { %v3874_v6 = vpop.eup %3873  ;;  %3558 = vmatprep.subr.bf16.mxu1 %v3557_v5 }
 0x1f8   : > { %v3876_v61 = vpop.eup %3875  ;;  %3560 = vmatpush3.bf16.msra.mxu1 %v3557_v5 }
 0x1f9   : > { %v3561_v7 = vpack.c.bf16 %v3874_v6, %v3876_v61 }
 0x1fb   : > { %v3878_v58 = vpop.eup %3877  ;;  %3562 = vmatprep.subr.bf16.mxu1 %v3561_v7 }
 0x1fc   : > { %v3880_v8 = vpop.eup %3879  ;;  %3564 = vmatpush3.bf16.msra.mxu1 %v3561_v7 }
 0x1fd   : > { %v3565_v9 = vpack.c.bf16 %v3878_v58, %v3880_v8  ;;  %v975_v8 = vpop.permute.xlu1 %974 }
 0x1ff   : > { %v3882_v10 = vpop.eup %3881  ;;  %3566 = vmatprep.subr.bf16.mxu1 %v3565_v9 }
 0x200   : > { %v3884_v11 = vpop.eup %3883  ;;  %3568 = vmatpush3.bf16.msra.mxu1 %v3565_v9 }
 0x201   : > { %v3569_v12 = vpack.c.bf16 %v3882_v10, %v3884_v11  ;;  %v970_v10 = vpop.permute.xlu0 %969 }
 0x203   : > { %3570 = vmatprep.subr.bf16.mxu1 %v3569_v12 }
 0x204   : > { %3572 = vmatpush3.bf16.msra.mxu1 %v3569_v12 }
 0x207   : > { %3171 = vmatmul.mubr.f32.vlgmr.msra.gmra.mrb[0].mxu1 %v2679_v2 }
 0x208   : > { %3173 = vmatprep.mubr.f32.mxu1 %v2680_v13 }
 0x20b   : > { %3174 = vmatmul.mubr.f32.gmra.mrb[2].mxu1 %v2681_v14 }
 0x20c   : > { %3176 = vmatprep.mubr.f32.mxu1 %v2682_v15 }
 0x20f   : > { %3177 = vmatmul.mubr.f32.gmra.mrb[4].mxu1 %v2683_v16 }
 0x210   : > { %3179 = vmatprep.mubr.f32.mxu1 %v2684_v17 }
 0x213   : > { %3180 = vmatmul.mubr.f32.gmra.mrb[6].mxu1 %v2685_v18  ;;  %v985_v18 = vpop.permute.xlu1 %984 }
 0x214   : > { %3182 = vmatprep.mubr.f32.mxu1 %v2686_v19 }
 0x217   : > { %3183 = vmatmul.mubr.f32.gmra.mrb[8].mxu1 %v2687_v20 }
 0x218   : > { %3185 = vmatprep.mubr.f32.mxu1 %v2688_v21  ;;  %v980_v21 = vpop.permute.xlu0 %979 }
 0x21b   : > { %3186 = vmatmul.mubr.f32.gmra.mrb[10].mxu1 %v2689_v22 }
 0x21c   : > { %3188 = vmatprep.mubr.f32.mxu1 %v2690_v23 }
 0x21f   : > { %3189 = vmatmul.mubr.f32.gmra.mrb[12].mxu1 %v2691_v24 }
 0x220   : > { %3191 = vmatprep.mubr.f32.mxu1 %v2692_v25 }
 0x223   : > { %3192 = vmatmul.mubr.f32.gmra.mrb[14].mxu1 %v2693_v27 }
 0x2da   : > { %v3172_v35 = vpop.f32.mrb[0].mxu1 }
 0x2db   : > { %v1059_v36 = vadd.f32 %v3172_v35, %v915_v29  ;;  %v1053_v37 = vpop.f32.mrb[1].mxu1 }
 0x2dc   : > { %v1054_v38 = vadd.f32 %v1053_v37, %v910_v30  ;;  %v2711_v37 = vld [vmem:[%s4983_s2 + $0x108] sm:$0xff] }
 0x2dd   : > { %3885 = vtanh.f32 %v1059_v36 }
 0x2de   : > { %3887 = vtanh.f32 %v1054_v38  ;;  %v3175_v41 = vpop.f32.mrb[2].mxu1  ;;  %v2712_v38 = vld [vmem:[%s4983_s2 + $0x110] sm:$0xff] }
 0x2df   : > { %v1069_v43 = vadd.f32 %v3175_v41, %v925_v31  ;;  %v1063_v44 = vpop.f32.mrb[3].mxu1  ;;  %v2714_v41 = vld [vmem:[%s4983_s2 + $0x120] sm:$0xff] }
 0x2e0   : > { %v1064_v33 = vadd.f32 %v1063_v44, %v920_v32  ;;  %v2717_v44 = vld [vmem:[%s4983_s2 + $0x138] sm:$0xff] }
 0x2e1   : > { %3889 = vtanh.f32 %v1069_v43  ;;  %v2716_v43 = vld [vmem:[%s4983_s2 + $0x130] sm:$0xff] }
 0x2e2   : > { %3891 = vtanh.f32 %v1064_v33  ;;  %v3178_v45 = vpop.f32.mrb[4].mxu1  ;;  %v2718_v33 = vld [vmem:[%s4983_s2 + $0x140] sm:$0xff] }
 0x2e3   : > { %v1079_v46 = vadd.f32 %v3178_v45, %v935_v34  ;;  %v1073_v48 = vpop.f32.mrb[5].mxu1  ;;  %v2719_v45 = vld [vmem:[%s4983_s2 + $0x148] sm:$0xff] }
 0x2e4   : > { %v1074_v50 = vadd.f32 %v1073_v48, %v930_v26  ;;  %v2721_v48 = vld [vmem:[%s4983_s2 + $0x158] sm:$0xff] }
 0x2e5   : > { %3893 = vtanh.f32 %v1079_v46  ;;  %v2720_v46 = vld [vmem:[%s4983_s2 + $0x150] sm:$0xff] }
 0x2e6   : > { %3895 = vtanh.f32 %v1074_v50  ;;  %v3181_v57 = vpop.f32.mrb[6].mxu1  ;;  %v2723_v50 = vld [vmem:[%s4983_s2 + $0x168] sm:$0xff] }
 0x2e7   : > { %v3886_v51 = vpop.eup %3885  ;;  %v1089_v52 = vadd.f32 %v3181_v57, %v945_v39  ;;  %v1083_v55 = vpop.f32.mrb[7].mxu1  ;;  %v2713_v39 = vld [vmem:[%s4983_s2 + $0x118] sm:$0xff] }
 0x2e8   : > { %v3888_v54 = vpop.eup %3887  ;;  %v1084_v47 = vadd.f32 %v1083_v55, %v940_v42  ;;  %v2715_v42 = vld [vmem:[%s4983_s2 + $0x128] sm:$0xff]  ;;  %v2725_v57 = vld [vmem:[%s4983_s2 + $0x178] sm:$0xff]  ;;  %v1185_v55 = vpop.permute.xlu0 %1184 }
 0x2e9   : > { %3897 = vtanh.f32 %v1089_v52  ;;  %v3573_v56 = vpack.c.bf16 %v3886_v51, %v3888_v54  ;;  %v1423_v51 = vld [vmem:[%s4985_s4] sm:$0xff]  ;;  %v1190_v52 = vpop.permute.xlu1 %1189 }
 0x2ea   : > { %3899 = vtanh.f32 %v1084_v47  ;;  %v3184_v60 = vpop.f32.mrb[8].mxu1  ;;  %3282 = vmatprep.mubr.f32.mxu1 %v1423_v51 }
 0x2eb   : > { %v3890_v63 = vpop.eup %3889  ;;  %v1099_v1 = vadd.f32 %v3184_v60, %v955_v49  ;;  %v1093_v53 = vpop.f32.mrb[9].mxu1  ;;  %3574 = vmatprep.subr.bf16.mxu0 %v3573_v56  ;;  %v2722_v49 = vld [vmem:[%s4983_s2 + $0x160] sm:$0xff] }
 0x2ec   : > { %v3892_v62 = vpop.eup %3891  ;;  %v1094_v3 = vadd.f32 %v1093_v53, %v950_v40  ;;  %3576 = vmatpush3.bf16.msra.mxu0 %v3573_v56  ;;  %v2724_v40 = vld [vmem:[%s4983_s2 + $0x170] sm:$0xff]  ;;  %v1195_v47 = vpop.permute.xlu0 %1194 }
 0x2ed   : > { %3901 = vtanh.f32 %v1099_v1  ;;  %v3577_v4 = vpack.c.bf16 %v3890_v63, %v3892_v62  ;;  %v1200_v54 = vpop.permute.xlu1 %1199 }
 0x2ee   : > { %3903 = vtanh.f32 %v1094_v3  ;;  %v3187_v5 = vpop.f32.mrb[10].mxu1 }
 0x2ef   : > { %v3894_v6 = vpop.eup %3893  ;;  %v1109_v61 = vadd.f32 %v3187_v5, %v965_v59  ;;  %v1103_v7 = vpop.f32.mrb[11].mxu1  ;;  %3578 = vmatprep.subr.bf16.mxu0 %v3577_v4 }
 0x2f0   : > { %v3896_v58 = vpop.eup %3895  ;;  %v1104_v9 = vadd.f32 %v1103_v7, %v960_v0  ;;  %3580 = vmatpush3.bf16.msra.mxu0 %v3577_v4  ;;  %v1205_v59 = vpop.permute.xlu0 %1204 }
 0x2f1   : > { %3905 = vtanh.f32 %v1109_v61  ;;  %v3581_v11 = vpack.c.bf16 %v3894_v6, %v3896_v58  ;;  %v1210_v56 = vpop.permute.xlu1 %1209 }
 0x2f2   : > { %3907 = vtanh.f32 %v1104_v9  ;;  %v3190_v12 = vpop.f32.mrb[12].mxu1 }
 0x2f3   : > { %v3898_v2 = vpop.eup %3897  ;;  %v1119_v13 = vadd.f32 %v3190_v12, %v975_v8  ;;  %v1113_v14 = vpop.f32.mrb[13].mxu1  ;;  %3582 = vmatprep.subr.bf16.mxu0 %v3581_v11 }
 0x2f4   : > { %v3900_v15 = vpop.eup %3899  ;;  %v1114_v16 = vadd.f32 %v1113_v14, %v970_v10  ;;  %3584 = vmatpush3.bf16.msra.mxu0 %v3581_v11  ;;  %v1215_v3 = vpop.permute.xlu0 %1214 }
 0x2f5   : > { %3909 = vtanh.f32 %v1119_v13  ;;  %v3585_v17 = vpack.c.bf16 %v3898_v2, %v3900_v15  ;;  %v1220_v53 = vpop.permute.xlu1 %1219 }
 0x2f6   : > { %3911 = vtanh.f32 %v1114_v16  ;;  %v3193_v19 = vpop.f32.mrb[14].mxu1 }
 0x2f7   : > { %v3902_v20 = vpop.eup %3901  ;;  %v1129_v22 = vadd.f32 %v3193_v19, %v985_v18  ;;  %v1123_v23 = vpop.f32.mrb[15].mxu1  ;;  %3586 = vmatprep.subr.bf16.mxu0 %v3585_v17 }
 0x2f8   : > { %v3904_v24 = vpop.eup %3903  ;;  %v1124_v25 = vadd.f32 %v1123_v23, %v980_v21  ;;  %3588 = vmatpush3.bf16.msra.mxu0 %v3585_v17  ;;  %v1225_v10 = vpop.permute.xlu0 %1224 }
 0x2f9   : > { %3913 = vtanh.f32 %v1129_v22  ;;  %v3589_v27 = vpack.c.bf16 %v3902_v20, %v3904_v24  ;;  %v1230_v8 = vpop.permute.xlu1 %1229 }
 0x2fa   : > { %3915 = vtanh.f32 %v1124_v25 }
 0x2fb   : > { %v3906_v28 = vpop.eup %3905  ;;  %3590 = vmatprep.subr.bf16.mxu0 %v3589_v27 }
 0x2fc   : > { %v3908_v29 = vpop.eup %3907  ;;  %3592 = vmatpush3.bf16.msra.mxu0 %v3589_v27  ;;  %v1235_v20 = vpop.permute.xlu0 %1234 }
 0x2fd   : > { %v3593_v30 = vpack.c.bf16 %v3906_v28, %v3908_v29  ;;  %v1240_v17 = vpop.permute.xlu1 %1239 }
 0x2ff   : > { %v3910_v31 = vpop.eup %3909  ;;  %3594 = vmatprep.subr.bf16.mxu0 %v3593_v30 }
 0x300   : > { %v3912_v32 = vpop.eup %3911  ;;  %3596 = vmatpush3.bf16.msra.mxu0 %v3593_v30 }
 0x301   : > { %v3597_v34 = vpack.c.bf16 %v3910_v31, %v3912_v32  ;;  %v1250_v32 = vpop.permute.xlu1 %1249 }
 0x303   : > { %v3914_v26 = vpop.eup %3913  ;;  %3598 = vmatprep.subr.bf16.mxu0 %v3597_v34 }
 0x304   : > { %v3916_v35 = vpop.eup %3915  ;;  %3600 = vmatpush3.bf16.msra.mxu0 %v3597_v34 }
 0x305   : > { %v3601_v36 = vpack.c.bf16 %v3914_v26, %v3916_v35  ;;  %v1245_v26 = vpop.permute.xlu0 %1244 }
 0x307   : > { %3602 = vmatprep.subr.bf16.mxu0 %v3601_v36 }
 0x308   : > { %3604 = vmatpush3.bf16.msra.mxu0 %v3601_v36 }
 0x30b   : > { %3227 = vmatmul.mubr.f32.vlgmr.msra.gmra.mrb[16].mxu0 %v2711_v37 }
 0x30c   : > { %3229 = vmatprep.mubr.f32.mxu0 %v2712_v38 }
 0x30f   : > { %3230 = vmatmul.mubr.f32.gmra.mrb[18].mxu0 %v2713_v39 }
 0x310   : > { %3232 = vmatprep.mubr.f32.mxu0 %v2714_v41 }
 0x313   : > { %3233 = vmatmul.mubr.f32.gmra.mrb[20].mxu0 %v2715_v42 }
 0x314   : > { %3235 = vmatprep.mubr.f32.mxu0 %v2716_v43 }
 0x317   : > { %3236 = vmatmul.mubr.f32.gmra.mrb[22].mxu0 %v2717_v44  ;;  %v1260_v44 = vpop.permute.xlu1 %1259 }
 0x318   : > { %3238 = vmatprep.mubr.f32.mxu0 %v2718_v33 }
 0x31b   : > { %3239 = vmatmul.mubr.f32.gmra.mrb[24].mxu0 %v2719_v45 }
 0x31c   : > { %3241 = vmatprep.mubr.f32.mxu0 %v2720_v46  ;;  %v1255_v46 = vpop.permute.xlu0 %1254 }
 0x31f   : > { %3242 = vmatmul.mubr.f32.gmra.mrb[26].mxu0 %v2721_v48 }
 0x320   : > { %3244 = vmatprep.mubr.f32.mxu0 %v2722_v49 }
 0x323   : > { %3245 = vmatmul.mubr.f32.gmra.mrb[28].mxu0 %v2723_v50 }
 0x324   : > { %3247 = vmatprep.mubr.f32.mxu0 %v2724_v40 }
 0x327   : > { %3248 = vmatmul.mubr.f32.gmra.mrb[30].mxu0 %v2725_v57 }
 0x3de   : > { %v3228_v60 = vpop.f32.mrb[16].mxu0 }
 0x3df   : > { %v1334_v63 = vadd.f32 %v3228_v60, %v1190_v52  ;;  %v1328_v0 = vpop.f32.mrb[17].mxu0 }
 0x3e0   : > { %v1329_v1 = vadd.f32 %v1328_v0, %v1185_v55  ;;  %v1424_v0 = vld [vmem:[%s4985_s4 + $0x8] sm:$0xff] }
 0x3e1   : > { %3917 = vtanh.f32 %v1334_v63 }
 0x3e2   : > { %3919 = vtanh.f32 %v1329_v1  ;;  %v3231_v62 = vpop.f32.mrb[18].mxu0  ;;  %v1425_v1 = vld [vmem:[%s4985_s4 + $0x10] sm:$0xff] }
 0x3e3   : > { %v1344_v4 = vadd.f32 %v3231_v62, %v1200_v54  ;;  %v1338_v5 = vpop.f32.mrb[19].mxu0  ;;  %v1427_v62 = vld [vmem:[%s4985_s4 + $0x20] sm:$0xff] }
 0x3e4   : > { %v1339_v6 = vadd.f32 %v1338_v5, %v1195_v47  ;;  %v1430_v5 = vld [vmem:[%s4985_s4 + $0x38] sm:$0xff] }
 0x3e5   : > { %3921 = vtanh.f32 %v1344_v4  ;;  %v1429_v4 = vld [vmem:[%s4985_s4 + $0x30] sm:$0xff] }
 0x3e6   : > { %3923 = vtanh.f32 %v1339_v6  ;;  %v3234_v61 = vpop.f32.mrb[20].mxu0  ;;  %v1431_v6 = vld [vmem:[%s4985_s4 + $0x40] sm:$0xff] }
 0x3e7   : > { %v1354_v7 = vadd.f32 %v3234_v61, %v1210_v56  ;;  %v1348_v58 = vpop.f32.mrb[21].mxu0  ;;  %v1432_v61 = vld [vmem:[%s4985_s4 + $0x48] sm:$0xff] }
 0x3e8   : > { %v1349_v9 = vadd.f32 %v1348_v58, %v1205_v59  ;;  %v1434_v58 = vld [vmem:[%s4985_s4 + $0x58] sm:$0xff] }
 0x3e9   : > { %3925 = vtanh.f32 %v1354_v7  ;;  %v1433_v7 = vld [vmem:[%s4985_s4 + $0x50] sm:$0xff] }
 0x3ea   : > { %3927 = vtanh.f32 %v1349_v9  ;;  %v3237_v11 = vpop.f32.mrb[22].mxu0  ;;  %v1436_v9 = vld [vmem:[%s4985_s4 + $0x68] sm:$0xff] }
 0x3eb   : > { %v3918_v12 = vpop.eup %3917  ;;  %v1364_v2 = vadd.f32 %v3237_v11, %v1220_v53  ;;  %v1358_v13 = vpop.f32.mrb[23].mxu0  ;;  %v1426_v53 = vld [vmem:[%s4985_s4 + $0x18] sm:$0xff] }
 0x3ec   : > { %v3920_v14 = vpop.eup %3919  ;;  %v1359_v15 = vadd.f32 %v1358_v13, %v1215_v3  ;;  %v1428_v3 = vld [vmem:[%s4985_s4 + $0x28] sm:$0xff]  ;;  %v1438_v11 = vld [vmem:[%s4985_s4 + $0x78] sm:$0xff]  ;;  %v1458_v13 = vpop.permute.xlu0 %1457 }
 0x3ed   : > { %3929 = vtanh.f32 %v1364_v2  ;;  %v3605_v16 = vpack.c.bf16 %v3918_v12, %v3920_v14  ;;  %v2742_v12 = vld [vmem:[%s4985_s4 + $0x80] sm:$0xff]  ;;  %v1463_v2 = vpop.permute.xlu1 %1462 }
 0x3ee   : > { %3931 = vtanh.f32 %v1359_v15  ;;  %v3240_v18 = vpop.f32.mrb[24].mxu0  ;;  %3338 = vmatprep.mubr.f32.mxu0 %v2742_v12 }
 0x3ef   : > { %v3922_v19 = vpop.eup %3921  ;;  %v1374_v21 = vadd.f32 %v3240_v18, %v1230_v8  ;;  %v1368_v22 = vpop.f32.mrb[25].mxu0  ;;  %3606 = vmatprep.subr.bf16.mxu1 %v3605_v16  ;;  %v1435_v8 = vld [vmem:[%s4985_s4 + $0x60] sm:$0xff] }
 0x3f0   : > { %v3924_v23 = vpop.eup %3923  ;;  %v1369_v24 = vadd.f32 %v1368_v22, %v1225_v10  ;;  %3608 = vmatpush3.bf16.msra.mxu1 %v3605_v16  ;;  %v1437_v10 = vld [vmem:[%s4985_s4 + $0x70] sm:$0xff]  ;;  %v1468_v15 = vpop.permute.xlu0 %1467 }
 0x3f1   : > { %3933 = vtanh.f32 %v1374_v21  ;;  %v3609_v25 = vpack.c.bf16 %v3922_v19, %v3924_v23  ;;  %v1473_v14 = vpop.permute.xlu1 %1472 }
 0x3f2   : > { %3935 = vtanh.f32 %v1369_v24  ;;  %v3243_v27 = vpop.f32.mrb[26].mxu0 }
 0x3f3   : > { %v3926_v28 = vpop.eup %3925  ;;  %v1384_v29 = vadd.f32 %v3243_v27, %v1240_v17  ;;  %v1378_v30 = vpop.f32.mrb[27].mxu0  ;;  %3610 = vmatprep.subr.bf16.mxu1 %v3609_v25 }
 0x3f4   : > { %v3928_v31 = vpop.eup %3927  ;;  %v1379_v34 = vadd.f32 %v1378_v30, %v1235_v20  ;;  %3612 = vmatpush3.bf16.msra.mxu1 %v3609_v25  ;;  %v1478_v17 = vpop.permute.xlu0 %1477 }
 0x3f5   : > { %3937 = vtanh.f32 %v1384_v29  ;;  %v3613_v35 = vpack.c.bf16 %v3926_v28, %v3928_v31  ;;  %v1483_v16 = vpop.permute.xlu1 %1482 }
 0x3f6   : > { %3939 = vtanh.f32 %v1379_v34  ;;  %v3246_v36 = vpop.f32.mrb[28].mxu0 }
 0x3f7   : > { %v3930_v37 = vpop.eup %3929  ;;  %v1394_v38 = vadd.f32 %v3246_v36, %v1250_v32  ;;  %v1388_v39 = vpop.f32.mrb[29].mxu0  ;;  %3614 = vmatprep.subr.bf16.mxu1 %v3613_v35 }
 0x3f8   : > { %v3932_v41 = vpop.eup %3931  ;;  %v1389_v42 = vadd.f32 %v1388_v39, %v1245_v26  ;;  %3616 = vmatpush3.bf16.msra.mxu1 %v3613_v35  ;;  %v1488_v27 = vpop.permute.xlu0 %1487 }
 0x3f9   : > { %3941 = vtanh.f32 %v1394_v38  ;;  %v3617_v43 = vpack.c.bf16 %v3930_v37, %v3932_v41  ;;  %v1493_v23 = vpop.permute.xlu1 %1492 }
 0x3fa   : > { %3943 = vtanh.f32 %v1389_v42  ;;  %v3249_v33 = vpop.f32.mrb[30].mxu0 }
 0x3fb   : > { %v3934_v45 = vpop.eup %3933  ;;  %v1404_v48 = vadd.f32 %v3249_v33, %v1260_v44  ;;  %v1398_v49 = vpop.f32.mrb[31].mxu0  ;;  %3618 = vmatprep.subr.bf16.mxu1 %v3617_v43 }
 0x3fc   : > { %v3936_v50 = vpop.eup %3935  ;;  %v1399_v40 = vadd.f32 %v1398_v49, %v1255_v46  ;;  %3620 = vmatpush3.bf16.msra.mxu1 %v3617_v43  ;;  %v1498_v41 = vpop.permute.xlu0 %1497 }
 0x3fd   : > { %3945 = vtanh.f32 %v1404_v48  ;;  %v3621_v57 = vpack.c.bf16 %v3934_v45, %v3936_v50  ;;  %v1503_v37 = vpop.permute.xlu1 %1502 }
 0x3fe   : > { %3947 = vtanh.f32 %v1399_v40 }
 0x3ff   : > { %v3938_v51 = vpop.eup %3937  ;;  %3622 = vmatprep.subr.bf16.mxu1 %v3621_v57 }
 0x400   : > { %v3940_v52 = vpop.eup %3939  ;;  %3624 = vmatpush3.bf16.msra.mxu1 %v3621_v57 }
 0x401   : > { %v3625_v55 = vpack.c.bf16 %v3938_v51, %v3940_v52  ;;  %v1513_v50 = vpop.permute.xlu1 %1512  ;;  %v1508_v51 = vpop.permute.xlu0 %1507 }
 0x403   : > { %v3942_v54 = vpop.eup %3941  ;;  %3626 = vmatprep.subr.bf16.mxu1 %v3625_v55 }
 0x404   : > { %v3944_v47 = vpop.eup %3943  ;;  %3628 = vmatpush3.bf16.msra.mxu1 %v3625_v55 }
 0x405   : > { %v3629_v56 = vpack.c.bf16 %v3942_v54, %v3944_v47 }
 0x407   : > { %v3946_v59 = vpop.eup %3945  ;;  %3630 = vmatprep.subr.bf16.mxu1 %v3629_v56 }
 0x408   : > { %v3948_v60 = vpop.eup %3947  ;;  %3632 = vmatpush3.bf16.msra.mxu1 %v3629_v56 }
 0x409   : > { %v3633_v63 = vpack.c.bf16 %v3946_v59, %v3948_v60 }
 0x40b   : > { %3634 = vmatprep.subr.bf16.mxu1 %v3633_v63 }
 0x40c   : > { %3636 = vmatpush3.bf16.msra.mxu1 %v3633_v63 }
 0x40f   : > { %3283 = vmatmul.mubr.f32.vlgmr.msra.gmra.mrb[16].mxu1 %v1424_v0 }
 0x410   : > { %3285 = vmatprep.mubr.f32.mxu1 %v1425_v1  ;;  %v1523_v1 = vpop.permute.xlu1 %1522 }
 0x413   : > { %3286 = vmatmul.mubr.f32.gmra.mrb[18].mxu1 %v1426_v53 }
 0x414   : > { %3288 = vmatprep.mubr.f32.mxu1 %v1427_v62 }
 0x417   : > { %3289 = vmatmul.mubr.f32.gmra.mrb[20].mxu1 %v1428_v3  ;;  %v1518_v3 = vpop.permute.xlu0 %1517 }
 0x418   : > { %3291 = vmatprep.mubr.f32.mxu1 %v1429_v4 }
 0x41b   : > { %3292 = vmatmul.mubr.f32.gmra.mrb[22].mxu1 %v1430_v5 }
 0x41c   : > { %3294 = vmatprep.mubr.f32.mxu1 %v1431_v6 }
 0x41f   : > { %3295 = vmatmul.mubr.f32.gmra.mrb[24].mxu1 %v1432_v61 }
 0x420   : > { %3297 = vmatprep.mubr.f32.mxu1 %v1433_v7 }
 0x423   : > { %3298 = vmatmul.mubr.f32.gmra.mrb[26].mxu1 %v1434_v58 }
 0x424   : > { %3300 = vmatprep.mubr.f32.mxu1 %v1435_v8 }
 0x427   : > { %3301 = vmatmul.mubr.f32.gmra.mrb[28].mxu1 %v1436_v9 }
 0x428   : > { %3303 = vmatprep.mubr.f32.mxu1 %v1437_v10  ;;  %v1533_v10 = vpop.permute.xlu1 %1532 }
 0x42b   : > { %3304 = vmatmul.mubr.f32.gmra.mrb[30].mxu1 %v1438_v11 }
 0x4e2   : > { %v3284_v18 = vpop.f32.mrb[16].mxu1 }
 0x4e3   : > { %v1607_v19 = vadd.f32 %v3284_v18, %v1463_v2  ;;  %v1601_v20 = vpop.f32.mrb[17].mxu1  ;;  %v1528_v2 = vpop.permute.xlu0 %1527 }
 0x4e4   : > { %v1602_v21 = vadd.f32 %v1601_v20, %v1458_v13  ;;  %v2743_v20 = vld [vmem:[%s4985_s4 + $0x88] sm:$0xff] }
 0x4e5   : > { %v1681_v22 = vmax.f32 %v1607_v19, 0.0 }
 0x4e6   : > { %v1680_v24 = vmax.f32 %v1602_v21, 0.0  ;;  %v3287_v25 = vpop.f32.mrb[18].mxu1  ;;  %v2744_v21 = vld [vmem:[%s4985_s4 + $0x90] sm:$0xff] }
 0x4e7   : > { %v1617_v28 = vadd.f32 %v3287_v25, %v1473_v14  ;;  %v1611_v29 = vpop.f32.mrb[19].mxu1  ;;  %v2748_v25 = vld [vmem:[%s4985_s4 + $0xb0] sm:$0xff] }
 0x4e8   : > { %v3637_v30 = vpack.c.bf16 %v1681_v22, %v1680_v24  ;;  %v1612_v31 = vadd.f32 %v1611_v29, %v1468_v15  ;;  %v2745_v22 = vld [vmem:[%s4985_s4 + $0x98] sm:$0xff]  ;;  %v2747_v24 = vld [vmem:[%s4985_s4 + $0xa8] sm:$0xff] }
 0x4e9   : > { %v1683_v32 = vmax.f32 %v1617_v28, 0.0  ;;  %v2750_v28 = vld [vmem:[%s4985_s4 + $0xc0] sm:$0xff]  ;;  %v2751_v29 = vld [vmem:[%s4985_s4 + $0xc8] sm:$0xff] }
 0x4ea   : > { %v1682_v34 = vmax.f32 %v1612_v31, 0.0  ;;  %v3290_v26 = vpop.f32.mrb[20].mxu1  ;;  %3638 = vmatprep.subr.bf16.mxu0 %v3637_v30  ;;  %v2753_v31 = vld [vmem:[%s4985_s4 + $0xd8] sm:$0xff] }
 0x4eb   : > { %v1627_v35 = vadd.f32 %v3290_v26, %v1483_v16  ;;  %v1621_v36 = vpop.f32.mrb[21].mxu1  ;;  %3640 = vmatpush3.bf16.msra.mxu0 %v3637_v30  ;;  %v2752_v30 = vld [vmem:[%s4985_s4 + $0xd0] sm:$0xff] }
 0x4ec   : > { %v3641_v38 = vpack.c.bf16 %v1683_v32, %v1682_v34  ;;  %v1622_v39 = vadd.f32 %v1621_v36, %v1478_v17  ;;  %v2754_v32 = vld [vmem:[%s4985_s4 + $0xe0] sm:$0xff]  ;;  %v2755_v34 = vld [vmem:[%s4985_s4 + $0xe8] sm:$0xff]  ;;  %v2756_v26 = vld [vmem:[%s4985_s4 + $0xf0] sm:$0xff] }
 0x4ed   : > { %v1685_v42 = vmax.f32 %v1627_v35, 0.0  ;;  %v2757_v35 = vld [vmem:[%s4985_s4 + $0xf8] sm:$0xff]  ;;  %v2774_v36 = vld [vmem:[%s4985_s4 + $0x100] sm:$0xff] }
 0x4ee   : > { %v1684_v43 = vmax.f32 %v1622_v39, 0.0  ;;  %v3293_v44 = vpop.f32.mrb[22].mxu1  ;;  %3642 = vmatprep.subr.bf16.mxu0 %v3641_v38  ;;  %3394 = vmatprep.mubr.f32.mxu1 %v2774_v36 }
 0x4ef   : > { %v1637_v33 = vadd.f32 %v3293_v44, %v1493_v23  ;;  %v1631_v45 = vpop.f32.mrb[23].mxu1  ;;  %3644 = vmatpush3.bf16.msra.mxu0 %v3641_v38  ;;  %v2746_v23 = vld [vmem:[%s4985_s4 + $0xa0] sm:$0xff]  ;;  %v1733_v38 = vpop.permute.xlu0 %1732 }
 0x4f0   : > { %v3645_v46 = vpack.c.bf16 %v1685_v42, %v1684_v43  ;;  %v1632_v48 = vadd.f32 %v1631_v45, %v1488_v27  ;;  %v2749_v27 = vld [vmem:[%s4985_s4 + $0xb8] sm:$0xff] }
 0x4f1   : > { %v1687_v49 = vmax.f32 %v1637_v33, 0.0 }
 0x4f2   : > { %v1686_v40 = vmax.f32 %v1632_v48, 0.0  ;;  %v3296_v57 = vpop.f32.mrb[24].mxu1  ;;  %3646 = vmatprep.subr.bf16.mxu0 %v3645_v46 }
 0x4f3   : > { %v1647_v52 = vadd.f32 %v3296_v57, %v1503_v37  ;;  %v1641_v55 = vpop.f32.mrb[25].mxu1  ;;  %3648 = vmatpush3.bf16.msra.mxu0 %v3645_v46  ;;  %v1738_v37 = vpop.permute.xlu1 %1737 }
 0x4f4   : > { %v3649_v54 = vpack.c.bf16 %v1687_v49, %v1686_v40  ;;  %v1642_v47 = vadd.f32 %v1641_v55, %v1498_v41  ;;  %v1743_v41 = vpop.permute.xlu0 %1742 }
 0x4f5   : > { %v1689_v56 = vmax.f32 %v1647_v52, 0.0 }
 0x4f6   : > { %v1688_v59 = vmax.f32 %v1642_v47, 0.0  ;;  %v3299_v60 = vpop.f32.mrb[26].mxu1  ;;  %3650 = vmatprep.subr.bf16.mxu0 %v3649_v54 }
 0x4f7   : > { %v1657_v63 = vadd.f32 %v3299_v60, %v1513_v50  ;;  %v1651_v0 = vpop.f32.mrb[27].mxu1  ;;  %3652 = vmatpush3.bf16.msra.mxu0 %v3649_v54  ;;  %v1748_v39 = vpop.permute.xlu1 %1747 }
 0x4f8   : > { %v3653_v53 = vpack.c.bf16 %v1689_v56, %v1688_v59  ;;  %v1652_v62 = vadd.f32 %v1651_v0, %v1508_v51  ;;  %v1753_v43 = vpop.permute.xlu0 %1752 }
 0x4f9   : > { %v1691_v4 = vmax.f32 %v1657_v63, 0.0 }
 0x4fa   : > { %v1690_v5 = vmax.f32 %v1652_v62, 0.0  ;;  %v3302_v6 = vpop.f32.mrb[28].mxu1  ;;  %3654 = vmatprep.subr.bf16.mxu0 %v3653_v53 }
 0x4fb   : > { %v1667_v61 = vadd.f32 %v3302_v6, %v1523_v1  ;;  %v1661_v7 = vpop.f32.mrb[29].mxu1  ;;  %3656 = vmatpush3.bf16.msra.mxu0 %v3653_v53  ;;  %v1758_v42 = vpop.permute.xlu1 %1757 }
 0x4fc   : > { %v3657_v58 = vpack.c.bf16 %v1691_v4, %v1690_v5  ;;  %v1662_v8 = vadd.f32 %v1661_v7, %v1518_v3  ;;  %v1763_v57 = vpop.permute.xlu0 %1762 }
 0x4fd   : > { %v1693_v9 = vmax.f32 %v1667_v61, 0.0 }
 0x4fe   : > { %v1692_v11 = vmax.f32 %v1662_v8, 0.0  ;;  %v3305_v12 = vpop.f32.mrb[30].mxu1  ;;  %3658 = vmatprep.subr.bf16.mxu0 %v3657_v58 }
 0x4ff   : > { %v1677_v13 = vadd.f32 %v3305_v12, %v1533_v10  ;;  %v1671_v14 = vpop.f32.mrb[31].mxu1  ;;  %3660 = vmatpush3.bf16.msra.mxu0 %v3657_v58  ;;  %v1768_v49 = vpop.permute.xlu1 %1767 }
 0x500   : > { %v3661_v15 = vpack.c.bf16 %v1693_v9, %v1692_v11  ;;  %v1672_v16 = vadd.f32 %v1671_v14, %v1528_v2  ;;  %v1773_v62 = vpop.permute.xlu0 %1772 }
 0x501   : > { %v1695_v17 = vmax.f32 %v1677_v13, 0.0 }
 0x502   : > { %v1694_v18 = vmax.f32 %v1672_v16, 0.0  ;;  %3662 = vmatprep.subr.bf16.mxu0 %v3661_v15 }
 0x503   : > { %3664 = vmatpush3.bf16.msra.mxu0 %v3661_v15  ;;  %v1778_v0 = vpop.permute.xlu1 %1777 }
 0x504   : > { %v3665_v19 = vpack.c.bf16 %v1695_v17, %v1694_v18  ;;  %v1783_v12 = vpop.permute.xlu0 %1782 }
 0x506   : > { %3666 = vmatprep.subr.bf16.mxu0 %v3665_v19 }
 0x507   : > { %3668 = vmatpush3.bf16.msra.mxu0 %v3665_v19  ;;  %v1788_v9 = vpop.permute.xlu1 %1787 }
 0x50a   : > { %3339 = vmatmul.mubr.f32.vlgmr.msra.gmra.mrb[32].mxu0 %v2743_v20 }
 0x50b   : > { %3341 = vmatprep.mubr.f32.mxu0 %v2744_v21  ;;  %v1798_v21 = vpop.permute.xlu1 %1797 }
 0x50e   : > { %3342 = vmatmul.mubr.f32.gmra.mrb[34].mxu0 %v2745_v22 }
 0x50f   : > { %3344 = vmatprep.mubr.f32.mxu0 %v2746_v23 }
 0x512   : > { %3345 = vmatmul.mubr.f32.gmra.mrb[36].mxu0 %v2747_v24  ;;  %v1793_v24 = vpop.permute.xlu0 %1792 }
 0x513   : > { %3347 = vmatprep.mubr.f32.mxu0 %v2748_v25 }
 0x516   : > { %3348 = vmatmul.mubr.f32.gmra.mrb[38].mxu0 %v2749_v27 }
 0x517   : > { %3350 = vmatprep.mubr.f32.mxu0 %v2750_v28 }
 0x51a   : > { %3351 = vmatmul.mubr.f32.gmra.mrb[40].mxu0 %v2751_v29 }
 0x51b   : > { %3353 = vmatprep.mubr.f32.mxu0 %v2752_v30 }
 0x51e   : > { %3354 = vmatmul.mubr.f32.gmra.mrb[42].mxu0 %v2753_v31 }
 0x51f   : > { %3356 = vmatprep.mubr.f32.mxu0 %v2754_v32 }
 0x522   : > { %3357 = vmatmul.mubr.f32.gmra.mrb[44].mxu0 %v2755_v34 }
 0x523   : > { %3359 = vmatprep.mubr.f32.mxu0 %v2756_v26  ;;  %v1808_v26 = vpop.permute.xlu1 %1807 }
 0x526   : > { %3360 = vmatmul.mubr.f32.gmra.mrb[46].mxu0 %v2757_v35 }
 0x5dd   : > { %v3340_v44 = vpop.f32.mrb[32].mxu0 }
 0x5de   : > { %v1882_v33 = vadd.f32 %v3340_v44, %v1738_v37  ;;  %v1876_v45 = vpop.f32.mrb[33].mxu0  ;;  %v1803_v37 = vpop.permute.xlu0 %1802 }
 0x5df   : > { %v1877_v46 = vadd.f32 %v1876_v45, %v1733_v38  ;;  %v2775_v45 = vld [vmem:[%s4985_s4 + $0x108] sm:$0xff] }
 0x5e0   : > { %v1956_v48 = vmax.f32 %v1882_v33, 0.0 }
 0x5e1   : > { %v1955_v50 = vmax.f32 %v1877_v46, 0.0  ;;  %v3343_v40 = vpop.f32.mrb[34].mxu0  ;;  %v2776_v46 = vld [vmem:[%s4985_s4 + $0x110] sm:$0xff] }
 0x5e2   : > { %v1892_v51 = vadd.f32 %v3343_v40, %v1748_v39  ;;  %v1886_v52 = vpop.f32.mrb[35].mxu0  ;;  %v2780_v40 = vld [vmem:[%s4985_s4 + $0x130] sm:$0xff] }
 0x5e3   : > { %v3669_v55 = vpack.c.bf16 %v1956_v48, %v1955_v50  ;;  %v1887_v54 = vadd.f32 %v1886_v52, %v1743_v41  ;;  %v2777_v48 = vld [vmem:[%s4985_s4 + $0x118] sm:$0xff]  ;;  %v2779_v50 = vld [vmem:[%s4985_s4 + $0x128] sm:$0xff] }
 0x5e4   : > { %v1958_v47 = vmax.f32 %v1892_v51, 0.0  ;;  %v2782_v51 = vld [vmem:[%s4985_s4 + $0x140] sm:$0xff]  ;;  %v2783_v52 = vld [vmem:[%s4985_s4 + $0x148] sm:$0xff] }
 0x5e5   : > { %v1957_v56 = vmax.f32 %v1887_v54, 0.0  ;;  %v3346_v59 = vpop.f32.mrb[36].mxu0  ;;  %3670 = vmatprep.subr.bf16.mxu1 %v3669_v55  ;;  %v2785_v54 = vld [vmem:[%s4985_s4 + $0x158] sm:$0xff] }
 0x5e6   : > { %v1902_v60 = vadd.f32 %v3346_v59, %v1758_v42  ;;  %v1896_v63 = vpop.f32.mrb[37].mxu0  ;;  %3672 = vmatpush3.bf16.msra.mxu1 %v3669_v55  ;;  %v2784_v55 = vld [vmem:[%s4985_s4 + $0x150] sm:$0xff] }
 0x5e7   : > { %v3673_v1 = vpack.c.bf16 %v1958_v47, %v1957_v56  ;;  %v1897_v53 = vadd.f32 %v1896_v63, %v1753_v43  ;;  %v2786_v47 = vld [vmem:[%s4985_s4 + $0x160] sm:$0xff]  ;;  %v2787_v56 = vld [vmem:[%s4985_s4 + $0x168] sm:$0xff]  ;;  %v2788_v59 = vld [vmem:[%s4985_s4 + $0x170] sm:$0xff] }
 0x5e8   : > { %v1960_v3 = vmax.f32 %v1902_v60, 0.0  ;;  %v2789_v60 = vld [vmem:[%s4985_s4 + $0x178] sm:$0xff]  ;;  %v2806_v63 = vld [vmem:[%s4985_s4 + $0x180] sm:$0xff] }
 0x5e9   : > { %v1959_v4 = vmax.f32 %v1897_v53, 0.0  ;;  %v3349_v5 = vpop.f32.mrb[38].mxu0  ;;  %3674 = vmatprep.subr.bf16.mxu1 %v3673_v1  ;;  %3450 = vmatprep.mubr.f32.mxu0 %v2806_v63 }
 0x5ea   : > { %v1912_v6 = vadd.f32 %v3349_v5, %v1768_v49  ;;  %v1906_v61 = vpop.f32.mrb[39].mxu0  ;;  %3676 = vmatpush3.bf16.msra.mxu1 %v3673_v1  ;;  %v2778_v49 = vld [vmem:[%s4985_s4 + $0x120] sm:$0xff]  ;;  %v2008_v1 = vpop.permute.xlu0 %2007 }
 0x5eb   : > { %v3677_v7 = vpack.c.bf16 %v1960_v3, %v1959_v4  ;;  %v1907_v58 = vadd.f32 %v1906_v61, %v1763_v57  ;;  %v2781_v57 = vld [vmem:[%s4985_s4 + $0x138] sm:$0xff] }
 0x5ec   : > { %v1962_v8 = vmax.f32 %v1912_v6, 0.0 }
 0x5ed   : > { %v1961_v10 = vmax.f32 %v1907_v58, 0.0  ;;  %v3352_v11 = vpop.f32.mrb[40].mxu0  ;;  %3678 = vmatprep.subr.bf16.mxu1 %v3677_v7 }
 0x5ee   : > { %v1922_v2 = vadd.f32 %v3352_v11, %v1778_v0  ;;  %v1916_v13 = vpop.f32.mrb[41].mxu0  ;;  %3680 = vmatpush3.bf16.msra.mxu1 %v3677_v7  ;;  %v2013_v0 = vpop.permute.xlu1 %2012 }
 0x5ef   : > { %v3681_v14 = vpack.c.bf16 %v1962_v8, %v1961_v10  ;;  %v1917_v15 = vadd.f32 %v1916_v13, %v1773_v62  ;;  %v2018_v62 = vpop.permute.xlu0 %2017 }
 0x5f0   : > { %v1964_v16 = vmax.f32 %v1922_v2, 0.0 }
 0x5f1   : > { %v1963_v17 = vmax.f32 %v1917_v15, 0.0  ;;  %v3355_v18 = vpop.f32.mrb[42].mxu0  ;;  %3682 = vmatprep.subr.bf16.mxu1 %v3681_v14 }
 0x5f2   : > { %v1932_v19 = vadd.f32 %v3355_v18, %v1788_v9  ;;  %v1926_v20 = vpop.f32.mrb[43].mxu0  ;;  %3684 = vmatpush3.bf16.msra.mxu1 %v3681_v14  ;;  %v2023_v53 = vpop.permute.xlu1 %2022 }
 0x5f3   : > { %v3685_v22 = vpack.c.bf16 %v1964_v16, %v1963_v17  ;;  %v1927_v23 = vadd.f32 %v1926_v20, %v1783_v12  ;;  %v2028_v4 = vpop.permute.xlu0 %2027 }
 0x5f4   : > { %v1966_v25 = vmax.f32 %v1932_v19, 0.0 }
 0x5f5   : > { %v1965_v27 = vmax.f32 %v1927_v23, 0.0  ;;  %v3358_v28 = vpop.f32.mrb[44].mxu0  ;;  %3686 = vmatprep.subr.bf16.mxu1 %v3685_v22 }
 0x5f6   : > { %v1942_v29 = vadd.f32 %v3358_v28, %v1798_v21  ;;  %v1936_v30 = vpop.f32.mrb[45].mxu0  ;;  %3688 = vmatpush3.bf16.msra.mxu1 %v3685_v22  ;;  %v2033_v3 = vpop.permute.xlu1 %2032 }
 0x5f7   : > { %v3689_v31 = vpack.c.bf16 %v1966_v25, %v1965_v27  ;;  %v1937_v32 = vadd.f32 %v1936_v30, %v1793_v24  ;;  %v2038_v11 = vpop.permute.xlu0 %2037 }
 0x5f8   : > { %v1968_v34 = vmax.f32 %v1942_v29, 0.0 }
 0x5f9   : > { %v1967_v35 = vmax.f32 %v1937_v32, 0.0  ;;  %v3361_v36 = vpop.f32.mrb[46].mxu0  ;;  %3690 = vmatprep.subr.bf16.mxu1 %v3689_v31 }
 0x5fa   : > { %v1952_v38 = vadd.f32 %v3361_v36, %v1808_v26  ;;  %v1946_v39 = vpop.f32.mrb[47].mxu0  ;;  %3692 = vmatpush3.bf16.msra.mxu1 %v3689_v31  ;;  %v2043_v8 = vpop.permute.xlu1 %2042 }
 0x5fb   : > { %v3693_v41 = vpack.c.bf16 %v1968_v34, %v1967_v35  ;;  %v1947_v42 = vadd.f32 %v1946_v39, %v1803_v37  ;;  %v2048_v23 = vpop.permute.xlu0 %2047 }
 0x5fc   : > { %v1970_v43 = vmax.f32 %v1952_v38, 0.0 }
 0x5fd   : > { %v1969_v44 = vmax.f32 %v1947_v42, 0.0  ;;  %3694 = vmatprep.subr.bf16.mxu1 %v3693_v41 }
 0x5fe   : > { %3696 = vmatpush3.bf16.msra.mxu1 %v3693_v41  ;;  %v2053_v20 = vpop.permute.xlu1 %2052 }
 0x5ff   : > { %v3697_v33 = vpack.c.bf16 %v1970_v43, %v1969_v44  ;;  %v2058_v36 = vpop.permute.xlu0 %2057 }
 0x601   : > { %3698 = vmatprep.subr.bf16.mxu1 %v3697_v33 }
 0x602   : > { %3700 = vmatpush3.bf16.msra.mxu1 %v3697_v33  ;;  %v2063_v34 = vpop.permute.xlu1 %2062 }
 0x605   : > { %3395 = vmatmul.mubr.f32.vlgmr.msra.gmra.mrb[32].mxu1 %v2775_v45 }
 0x606   : > { %3397 = vmatprep.mubr.f32.mxu1 %v2776_v46  ;;  %v2073_v46 = vpop.permute.xlu1 %2072 }
 0x609   : > { %3398 = vmatmul.mubr.f32.gmra.mrb[34].mxu1 %v2777_v48 }
 0x60a   : > { %3400 = vmatprep.mubr.f32.mxu1 %v2778_v49 }
 0x60d   : > { %3401 = vmatmul.mubr.f32.gmra.mrb[36].mxu1 %v2779_v50  ;;  %v2068_v50 = vpop.permute.xlu0 %2067 }
 0x60e   : > { %3403 = vmatprep.mubr.f32.mxu1 %v2780_v40 }
 0x611   : > { %3404 = vmatmul.mubr.f32.gmra.mrb[38].mxu1 %v2781_v57 }
 0x612   : > { %3406 = vmatprep.mubr.f32.mxu1 %v2782_v51 }
 0x615   : > { %3407 = vmatmul.mubr.f32.gmra.mrb[40].mxu1 %v2783_v52 }
 0x616   : > { %3409 = vmatprep.mubr.f32.mxu1 %v2784_v55 }
 0x619   : > { %3410 = vmatmul.mubr.f32.gmra.mrb[42].mxu1 %v2785_v54 }
 0x61a   : > { %3412 = vmatprep.mubr.f32.mxu1 %v2786_v47 }
 0x61d   : > { %3413 = vmatmul.mubr.f32.gmra.mrb[44].mxu1 %v2787_v56 }
 0x61e   : > { %3415 = vmatprep.mubr.f32.mxu1 %v2788_v59  ;;  %v2083_v59 = vpop.permute.xlu1 %2082 }
 0x621   : > { %3416 = vmatmul.mubr.f32.gmra.mrb[46].mxu1 %v2789_v60 }
 0x6d8   : > { %v3396_v5 = vpop.f32.mrb[32].mxu1 }
 0x6d9   : > { %v2157_v6 = vadd.f32 %v3396_v5, %v2013_v0  ;;  %v2151_v61 = vpop.f32.mrb[33].mxu1  ;;  %v2078_v0 = vpop.permute.xlu0 %2077 }
 0x6da   : > { %v2152_v7 = vadd.f32 %v2151_v61, %v2008_v1  ;;  %v2807_v61 = vld [vmem:[%s4985_s4 + $0x188] sm:$0xff] }
 0x6db   : > { %v2231_v58 = vmax.f32 %v2157_v6, 0.0 }
 0x6dc   : > { %v2230_v9 = vmax.f32 %v2152_v7, 0.0  ;;  %v3399_v10 = vpop.f32.mrb[34].mxu1  ;;  %v2808_v7 = vld [vmem:[%s4985_s4 + $0x190] sm:$0xff] }
 0x6dd   : > { %v2167_v12 = vadd.f32 %v3399_v10, %v2023_v53  ;;  %v2161_v2 = vpop.f32.mrb[35].mxu1  ;;  %v2812_v10 = vld [vmem:[%s4985_s4 + $0x1b0] sm:$0xff] }
 0x6de   : > { %v3701_v13 = vpack.c.bf16 %v2231_v58, %v2230_v9  ;;  %v2162_v14 = vadd.f32 %v2161_v2, %v2018_v62  ;;  %v2809_v58 = vld [vmem:[%s4985_s4 + $0x198] sm:$0xff]  ;;  %v2811_v9 = vld [vmem:[%s4985_s4 + $0x1a8] sm:$0xff] }
 0x6df   : > { %v2233_v15 = vmax.f32 %v2167_v12, 0.0  ;;  %v2814_v12 = vld [vmem:[%s4985_s4 + $0x1c0] sm:$0xff]  ;;  %v2815_v2 = vld [vmem:[%s4985_s4 + $0x1c8] sm:$0xff] }
 0x6e0   : > { %v2232_v16 = vmax.f32 %v2162_v14, 0.0  ;;  %v3402_v17 = vpop.f32.mrb[36].mxu1  ;;  %3702 = vmatprep.subr.bf16.mxu0 %v3701_v13  ;;  %v2817_v14 = vld [vmem:[%s4985_s4 + $0x1d8] sm:$0xff] }
 0x6e1   : > { %v2177_v18 = vadd.f32 %v3402_v17, %v2033_v3  ;;  %v2171_v19 = vpop.f32.mrb[37].mxu1  ;;  %3704 = vmatpush3.bf16.msra.mxu0 %v3701_v13  ;;  %v2816_v13 = vld [vmem:[%s4985_s4 + $0x1d0] sm:$0xff] }
 0x6e2   : > { %v3705_v21 = vpack.c.bf16 %v2233_v15, %v2232_v16  ;;  %v2172_v22 = vadd.f32 %v2171_v19, %v2028_v4  ;;  %v2818_v15 = vld [vmem:[%s4985_s4 + $0x1e0] sm:$0xff]  ;;  %v2819_v16 = vld [vmem:[%s4985_s4 + $0x1e8] sm:$0xff]  ;;  %v2820_v17 = vld [vmem:[%s4985_s4 + $0x1f0] sm:$0xff]  ;;  %v4015_v19 = vmov 0.0|0.0  }
 0x6e3   : > { %v2235_v24 = vmax.f32 %v2177_v18, 0.0  ;;  %v2821_v18 = vld [vmem:[%s4985_s4 + $0x1f8] sm:$0xff]  ;;  %3733 = vmatprep.subr.bf16.mxu1 %v4015_v19 }
 0x6e4   : > { %v2234_v25 = vmax.f32 %v2172_v22, 0.0  ;;  %v3405_v27 = vpop.f32.mrb[38].mxu1  ;;  %3706 = vmatprep.subr.bf16.mxu0 %v3705_v21  ;;  %v2283_v22 = vpop.permute.xlu0 %2282 }
 0x6e5   : > { %v2187_v28 = vadd.f32 %v3405_v27, %v2043_v8  ;;  %v2181_v29 = vpop.f32.mrb[39].mxu1  ;;  %3708 = vmatpush3.bf16.msra.mxu0 %v3705_v21  ;;  %v2810_v8 = vld [vmem:[%s4985_s4 + $0x1a0] sm:$0xff]  ;;  %v2288_v21 = vpop.permute.xlu1 %2287 }
 0x6e6   : > { %v3709_v30 = vpack.c.bf16 %v2235_v24, %v2234_v25  ;;  %v2182_v31 = vadd.f32 %v2181_v29, %v2038_v11  ;;  %v2813_v11 = vld [vmem:[%s4985_s4 + $0x1b8] sm:$0xff] }
 0x6e7   : > { %v2237_v32 = vmax.f32 %v2187_v28, 0.0 }
 0x6e8   : > { %v2236_v26 = vmax.f32 %v2182_v31, 0.0  ;;  %v3408_v35 = vpop.f32.mrb[40].mxu1  ;;  %3710 = vmatprep.subr.bf16.mxu0 %v3709_v30  ;;  %v2293_v24 = vpop.permute.xlu0 %2292 }
 0x6e9   : > { %v2197_v37 = vadd.f32 %v3408_v35, %v2053_v20  ;;  %v2191_v38 = vpop.f32.mrb[41].mxu1  ;;  %3712 = vmatpush3.bf16.msra.mxu0 %v3709_v30  ;;  %v4017_v20 = vmov 0.0  }
 0x6ea   : > { %v3713_v39 = vpack.c.bf16 %v2237_v32, %v2236_v26  ;;  %v2192_v41 = vadd.f32 %v2191_v38, %v2048_v23  ;;  %3506 = vmatprep.mubr.msk.f32.mxu1 %vm4016_vm0, %v4017_v20  ;;  %v2298_v23 = vpop.permute.xlu1 %2297 }
 0x6eb   : > { %v2239_v42 = vmax.f32 %v2197_v37, 0.0 }
 0x6ec   : > { %v2238_v43 = vmax.f32 %v2192_v41, 0.0  ;;  %v3411_v44 = vpop.f32.mrb[42].mxu1  ;;  %3714 = vmatprep.subr.bf16.mxu0 %v3713_v39  ;;  %v2303_v27 = vpop.permute.xlu0 %2302 }
 0x6ed   : > { %v2207_v33 = vadd.f32 %v3411_v44, %v2063_v34  ;;  %v2201_v45 = vpop.f32.mrb[43].mxu1  ;;  %3716 = vmatpush3.bf16.msra.mxu0 %v3713_v39 }
 0x6ee   : > { %v3717_v48 = vpack.c.bf16 %v2239_v42, %v2238_v43  ;;  %v2202_v49 = vadd.f32 %v2201_v45, %v2058_v36  ;;  %v2308_v25 = vpop.permute.xlu1 %2307 }
 0x6ef   : > { %v2241_v40 = vmax.f32 %v2207_v33, 0.0 }
 0x6f0   : > { %v2240_v57 = vmax.f32 %v2202_v49, 0.0  ;;  %v3414_v51 = vpop.f32.mrb[44].mxu1  ;;  %3718 = vmatprep.subr.bf16.mxu0 %v3717_v48  ;;  %v2313_v36 = vpop.permute.xlu0 %2312 }
 0x6f1   : > { %v2217_v52 = vadd.f32 %v3414_v51, %v2073_v46  ;;  %v2211_v55 = vpop.f32.mrb[45].mxu1  ;;  %3720 = vmatpush3.bf16.msra.mxu0 %v3717_v48 }
 0x6f2   : > { %v3721_v54 = vpack.c.bf16 %v2241_v40, %v2240_v57  ;;  %v2212_v47 = vadd.f32 %v2211_v55, %v2068_v50  ;;  %v2318_v34 = vpop.permute.xlu1 %2317 }
 0x6f3   : > { %v2243_v56 = vmax.f32 %v2217_v52, 0.0 }
 0x6f4   : > { %v2242_v60 = vmax.f32 %v2212_v47, 0.0  ;;  %v3417_v63 = vpop.f32.mrb[46].mxu1  ;;  %3722 = vmatprep.subr.bf16.mxu0 %v3721_v54  ;;  %v2323_v50 = vpop.permute.xlu0 %2322 }
 0x6f5   : > { %v2227_v1 = vadd.f32 %v3417_v63, %v2083_v59  ;;  %v2221_v53 = vpop.f32.mrb[47].mxu1  ;;  %3724 = vmatpush3.bf16.msra.mxu0 %v3721_v54 }
 0x6f6   : > { %v3725_v62 = vpack.c.bf16 %v2243_v56, %v2242_v60  ;;  %v2222_v3 = vadd.f32 %v2221_v53, %v2078_v0  ;;  %v2328_v46 = vpop.permute.xlu1 %2327 }
 0x6f7   : > { %v2245_v4 = vmax.f32 %v2227_v1, 0.0 }
 0x6f8   : > { %v2244_v5 = vmax.f32 %v2222_v3, 0.0  ;;  %3726 = vmatprep.subr.bf16.mxu0 %v3725_v62  ;;  %v2333_v0 = vpop.permute.xlu0 %2332 }
 0x6f9   : > { %3728 = vmatpush3.bf16.msra.mxu0 %v3725_v62 }
 0x6fa   : > { %v3729_v6 = vpack.c.bf16 %v2245_v4, %v2244_v5  ;;  %v2338_v59 = vpop.permute.xlu1 %2337 }
 0x6fc   : > { %3730 = vmatprep.subr.bf16.mxu0 %v3729_v6 }
 0x6fd   : > { %3732 = vmatpush3.bf16.msra.mxu0 %v3729_v6 }
 0x700   : > { %3451 = vmatmul.mubr.f32.vlgmr.msra.gmra.mrb[48].mxu0 %v2807_v61 }
 0x701   : > { %3453 = vmatprep.mubr.f32.mxu0 %v2808_v7 }
 0x704   : > { %3454 = vmatmul.mubr.f32.gmra.mrb[50].mxu0 %v2809_v58  ;;  %v2348_v58 = vpop.permute.xlu1 %2347 }
 0x705   : > { %3456 = vmatprep.mubr.f32.mxu0 %v2810_v8 }
 0x708   : > { %3457 = vmatmul.mubr.f32.gmra.mrb[52].mxu0 %v2811_v9 }
 0x709   : > { %3459 = vmatprep.mubr.f32.mxu0 %v2812_v10  ;;  %v2343_v10 = vpop.permute.xlu0 %2342 }
 0x70c   : > { %3460 = vmatmul.mubr.f32.gmra.mrb[54].mxu0 %v2813_v11 }
 0x70d   : > { %3462 = vmatprep.mubr.f32.mxu0 %v2814_v12 }
 0x710   : > { %3463 = vmatmul.mubr.f32.gmra.mrb[56].mxu0 %v2815_v2 }
 0x711   : > { %3465 = vmatprep.mubr.f32.mxu0 %v2816_v13 }
 0x714   : > { %3466 = vmatmul.mubr.f32.gmra.mrb[58].mxu0 %v2817_v14 }
 0x715   : > { %3468 = vmatprep.mubr.f32.mxu0 %v2818_v15 }
 0x718   : > { %3469 = vmatmul.mubr.f32.gmra.mrb[60].mxu0 %v2819_v16 }
 0x719   : > { %3471 = vmatprep.mubr.f32.mxu0 %v2820_v17 }
 0x71c   : > { %3472 = vmatmul.mubr.f32.gmra.mrb[62].mxu0 %v2821_v18  ;;  %v2358_v18 = vpop.permute.xlu1 %2357 }
 0x7d3   : > { %v3452_v28 = vpop.f32.mrb[48].mxu0 }
 0x7d4   : > { %v2432_v29 = vadd.f32 %v3452_v28, %v2288_v21  ;;  %v2426_v30 = vpop.f32.mrb[49].mxu0 }
 0x7d5   : > { %v2427_v31 = vadd.f32 %v2426_v30, %v2283_v22  ;;  %v2353_v22 = vpop.permute.xlu0 %2352 }
 0x7d6   : > { %v2506_v32 = vmax.f32 %v2432_v29, 0.0 }
 0x7d7   : > { %v2505_v26 = vmax.f32 %v2427_v31, 0.0  ;;  %v3455_v35 = vpop.f32.mrb[50].mxu0  ;;  %v2521_v31 = vld [vmem:[%s4987_s6] sm:$0x1] }
 0x7d8   : > { %v2442_v37 = vadd.f32 %v3455_v35, %v2298_v23  ;;  %v2436_v38 = vpop.f32.mrb[51].mxu0 }
 0x7d9   : > { %v3734_v39 = vpack.c.bf16 %v2506_v32, %v2505_v26  ;;  %v2437_v41 = vadd.f32 %v2436_v38, %v2293_v24  ;;  %v2528_v32 = vlaneseq  ;;  %v2526_v35 = vpop.permute.xlu0 %2525 }
 0x7da   : > { %v2508_v42 = vmax.f32 %v2442_v37, 0.0 }
 0x7db   : > { %v2507_v43 = vmax.f32 %v2437_v41, 0.0  ;;  %v3458_v44 = vpop.f32.mrb[52].mxu0  ;;  %3735 = vmatpush3.bf16.msra.mxu1 %v3734_v39 }
 0x7dc   : > { %v2452_v33 = vadd.f32 %v3458_v44, %v2308_v25  ;;  %v2446_v45 = vpop.f32.mrb[53].mxu0  ;;  %3736 = vmatprep.subr.bf16.mxu1 %v4015_v19 }
 0x7dd   : > { %v3737_v48 = vpack.c.bf16 %v2508_v42, %v2507_v43  ;;  %v2447_v49 = vadd.f32 %v2446_v45, %v2303_v27 }
 0x7de   : > { %v2510_v40 = vmax.f32 %v2452_v33, 0.0 }
 0x7df   : > { %v2509_v57 = vmax.f32 %v2447_v49, 0.0  ;;  %v3461_v51 = vpop.f32.mrb[54].mxu0  ;;  %3738 = vmatpush3.bf16.msra.mxu1 %v3737_v48 }
 0x7e0   : > { %v2462_v52 = vadd.f32 %v3461_v51, %v2318_v34  ;;  %v2456_v55 = vpop.f32.mrb[55].mxu0  ;;  %3739 = vmatprep.subr.bf16.mxu1 %v4015_v19  ;;  %v2529_v34 = vshrl.u32 %v2528_v32, 7 }
 0x7e1   : > { %v3740_v54 = vpack.c.bf16 %v2510_v40, %v2509_v57  ;;  %v2457_v47 = vadd.f32 %v2456_v55, %v2313_v36 }
 0x7e2   : > { %v2512_v56 = vmax.f32 %v2462_v52, 0.0  ;;  %v2530_v26 = vsub.s32 0, %v2529_v34 }
 0x7e3   : > { %v2511_v60 = vmax.f32 %v2457_v47, 0.0  ;;  %v3464_v63 = vpop.f32.mrb[56].mxu0  ;;  %3741 = vmatpush3.bf16.msra.mxu1 %v3740_v54 }
 0x7e4   : > { %v2472_v1 = vadd.f32 %v3464_v63, %v2328_v46  ;;  %v2466_v53 = vpop.f32.mrb[57].mxu0  ;;  %3742 = vmatprep.subr.bf16.mxu1 %v4015_v19  ;;  %v2531_v36 = vrot.slane %v2526_v35, %v2530_v26 }
 0x7e5   : > { %v3743_v62 = vpack.c.bf16 %v2512_v56, %v2511_v60  ;;  %v2467_v3 = vadd.f32 %v2466_v53, %v2323_v50 }
 0x7e6   : > { %v2514_v4 = vmax.f32 %v2472_v1, 0.0 }
 0x7e7   : > { %v2513_v5 = vmax.f32 %v2467_v3, 0.0  ;;  %v3467_v6 = vpop.f32.mrb[58].mxu0  ;;  %3744 = vmatpush3.bf16.msra.mxu1 %v3743_v62 }
 0x7e8   : > { %v2482_v61 = vadd.f32 %v3467_v6, %v2338_v59  ;;  %v2476_v7 = vpop.f32.mrb[59].mxu0  ;;  %3745 = vmatprep.subr.bf16.mxu1 %v4015_v19 }
 0x7e9   : > { %v3746_v8 = vpack.c.bf16 %v2514_v4, %v2513_v5  ;;  %v2477_v9 = vadd.f32 %v2476_v7, %v2333_v0 }
 0x7ea   : > { %v2516_v11 = vmax.f32 %v2482_v61, 0.0 }
 0x7eb   : > { %v2515_v12 = vmax.f32 %v2477_v9, 0.0  ;;  %v3470_v2 = vpop.f32.mrb[60].mxu0  ;;  %3747 = vmatpush3.bf16.msra.mxu1 %v3746_v8 }
 0x7ec   : > { %v2492_v13 = vadd.f32 %v3470_v2, %v2348_v58  ;;  %v2486_v14 = vpop.f32.mrb[61].mxu0  ;;  %3748 = vmatprep.subr.bf16.mxu1 %v4015_v19 }
 0x7ed   : > { %v3749_v15 = vpack.c.bf16 %v2516_v11, %v2515_v12  ;;  %v2487_v16 = vadd.f32 %v2486_v14, %v2343_v10 }
 0x7ee   : > { %v2518_v17 = vmax.f32 %v2492_v13, 0.0 }
 0x7ef   : > { %v2517_v20 = vmax.f32 %v2487_v16, 0.0  ;;  %v3473_v21 = vpop.f32.mrb[62].mxu0  ;;  %3750 = vmatpush3.bf16.msra.mxu1 %v3749_v15 }
 0x7f0   : > { %v2502_v23 = vadd.f32 %v3473_v21, %v2358_v18  ;;  %v2496_v24 = vpop.f32.mrb[63].mxu0  ;;  %3751 = vmatprep.subr.bf16.mxu1 %v4015_v19 }
 0x7f1   : > { %v3752_v25 = vpack.c.bf16 %v2518_v17, %v2517_v20  ;;  %v2497_v27 = vadd.f32 %v2496_v24, %v2353_v22 }
 0x7f2   : > { %v2520_v28 = vmax.f32 %v2502_v23, 0.0 }
 0x7f3   : > { %v2519_v29 = vmax.f32 %v2497_v27, 0.0  ;;  %3753 = vmatpush3.bf16.msra.mxu1 %v3752_v25 }
 0x7f4   : > { %3754 = vmatprep.subr.bf16.mxu1 %v4015_v19 }
 0x7f5   : > { %v3755_v30 = vpack.c.bf16 %v2520_v28, %v2519_v29 }
 0x7f7   : > { %3756 = vmatpush3.bf16.msra.mxu1 %v3755_v30 }
 0x7fa   : > { %3507 = vmatmul.mubr.f32.vlgmr.msra.gmra.mrb[48].mxu1 %v2521_v31 }
 0x8cd   : > { %v2598_v37 = vpop.f32.mrb[48].mxu1 }
 0x8ce   : > { %v2599_v38 = vadd.f32 %v2598_v37, %v2531_v36  ;;  %v3508_v19 = vpop.f32.mrb[49].mxu1 }
 0x8d0   : > { %2602 = vst [vmem:[%s297_s14] sm:$0x1] %v2599_v38 }
 0x8d1   : > { %3962 = shalt.err (!%p3959_p3)
}
 0x8d2   : > { %s3963_s26 = scalar_lea.hbm %s4939_s21, 16  ;;  %s3967_s11 = scalar_lea.hbm %s4989_s8, 32 }
 0x8d3   : > { %p3964_p4 = scmp.ne.s32.totalorder %s4939_s21, %s3963_s26  ;;  %p3968_p9 = scmp.lt.u32.totalorder %s4939_s21, %s4989_s8 }
 0x8d4   : > { %p3969_p10 = scmp.lt.u32.totalorder %s3967_s11, %s3963_s26  ;;  %p3971_p12 = scmp.lt.u32.totalorder %s3963_s26, %s4939_s21 }
 0x8d5   : > { %p3965_p7 = pnand %p3964_p4, %p4105_p5 }
 0x8d6   : > { %p3970_p11 = por %p3969_p10, %p3968_p9 }
 0x8d7   : > { %p3966_p8 = pneg %p3965_p7 }
 0x8d8   : > { %p3972_p13 = por %p3971_p12, %p3970_p11 }
 0x8da   : > { %p3973_p0 = pnand %p3972_p13, %p3966_p8 }
 0x8dc   : > { %3976 = shalt.err (!%p3973_p0)
}
 0x8dd   : > { %3757 = dma.vmem_to_hbm [thread:$0]  (%p4105_p5), %s4941_s18, 16, %s4939_s21, %s2604_s22  }
 0x8de PF: > { %p3763_p1 = scmp.ge.s32.totalorder %s4011_s10, 2  ;;  %s2628_s19 = sand.u32 1, %s3999_s29  }
 0x8df   : > { %s2629_s20 = scalar_lea.sflag [#allocation4], %s2628_s19 }
 0x8e0   : > { %p3760_p2 = pnand %p3763_p1, %p4109_p6 }
 0x8e2   : > { %3994 = dma.done.wait (!%p3760_p2), %s2629_s20, 16  }
 0x8e3   : > { %3996 = vsyncadd (!%p3760_p2), %s2629_s20, 4294967280  ;;  %p20_p3 = scmp.ge.s32.totalorder %s4092_s12, 4   ;;  %s4992_s29 = smov %s4003_s30 }
 0x8e4   : > { %s4993_s30 = smov %s4007_s9  ;;  %s4994_s9 = smov %s4103_s15 }
 0x8e5   : > { %s4995_s10 = smov %s4092_s12  ;;  %22 = sbr.rel (!%p20_p3) target bundleno = 6 (0x6), region = 97 }
 0x8ec   :  { %2633 = vsyncpa [#allocation4], 1 }
 0x8ed   :  { %2635 = vsyncpa [#allocation4 + $0x1], 1 }

</bundles_post_ra>
